<compile_context>
chip_gen: v7x
topology: tpu7x:2x2x1
jax: 0.10.0
libtpu: 0.0.40
codegen_flags: <defaults>
</compile_context>

<pallas_src>
import jax
import jax.numpy as jnp
from jax.experimental import pallas as pl
from jax.experimental.pallas import tpu as pltpu


def _zero_border(buf, Hh, Wh, C):
    """Zero only the 1-pixel halo of a (Hh+2, Wh+2, C) padded scratch buffer."""
    buf[pl.ds(0, 1), :, :] = jnp.zeros((1, Wh + 2, C), jnp.float32)
    buf[pl.ds(Hh + 1, 1), :, :] = jnp.zeros((1, Wh + 2, C), jnp.float32)
    buf[pl.ds(1, Hh), pl.ds(0, 1), :] = jnp.zeros((Hh, 1, C), jnp.float32)
    buf[pl.ds(1, Hh), pl.ds(Wh + 1, 1), :] = jnp.zeros((Hh, 1, C), jnp.float32)


def _im2col_3x3(pad, patch_buf, Hh, Wh, C):
    """Pack the 9 shifted 3x3-tap windows of `pad` into patch_buf (Hh*Wh, 9*C)."""
    M = Hh * Wh
    for dy in range(3):
        for dx in range(3):
            win = pad[pl.ds(dy, Hh), pl.ds(dx, Wh), :]            # (Hh, Wh, C)
            k = dy * 3 + dx
            patch_buf[:, pl.ds(k * C, C)] = win.reshape(M, C)


def _down_kernel(x_ref, w1_ref, b1_ref, w2_ref, b2_ref,
                 o_ref, pad1, pad2, patch1, patch2):
    """One batch element per grid step.

    x_ref  : (1, 2*Hh, Wh, 2*Cin)  input with each horizontal pixel pair grouped
                                   with the channel dim (free wrapper reshape)
    w1_ref : (9*Cin, Cmid)         conv1 weights, BN1 scale folded in, (dy,dx,cin) rows
    b1_ref : (1, Cmid)             folded BN1 bias
    w2_ref : (Cout, 9*Cmid)        conv2 weights, BN2 scale folded in, (dy,dx,cmid) cols
    b2_ref : (Cout, 1)             folded BN2 bias (channel-major)
    o_ref  : (1, Cout, Hh*Wh)      channel-major output block (lane-dense minor dim)
    pad1   : VMEM (Hh+2, Wh+2, Cin)   zero-haloed conv1 input
    pad2   : VMEM (Hh+2, Wh+2, Cmid)  zero-haloed conv2 input
    patch1 : VMEM (Hh*Wh, 9*Cin)      im2col buffer for conv1
    patch2 : VMEM (Hh*Wh, 9*Cmid)     im2col buffer for conv2
    """
    Hh = pad1.shape[0] - 2
    Wh = pad1.shape[1] - 2
    Cin = pad1.shape[2]
    Cmid = pad2.shape[2]
    M = Hh * Wh

    # --- MaxPool2d(2): two static lane slices (W pairs) + a leading-dim split (H pairs)
    x = x_ref[0]                                          # (2*Hh, Wh, 2*Cin)
    xw = jnp.maximum(x[:, :, :Cin], x[:, :, Cin:])        # (2*Hh, Wh, Cin)
    xh = xw.reshape(Hh, 2, Wh, Cin)
    pooled = jnp.maximum(xh[:, 0], xh[:, 1])              # (Hh, Wh, Cin)

    # --- Conv1 (3x3, pad=1, no bias) + BN1 + ReLU: single (M,9Cin)@(9Cin,Cmid) matmul
    _zero_border(pad1, Hh, Wh, Cin)
    pad1[pl.ds(1, Hh), pl.ds(1, Wh), :] = pooled
    _im2col_3x3(pad1, patch1, Hh, Wh, Cin)
    acc1 = jnp.dot(patch1[...], w1_ref[...], preferred_element_type=jnp.float32)
    h1 = jnp.maximum(acc1 + b1_ref[...], 0.0)             # (M, Cmid)

    # --- Conv2 (3x3, pad=1, no bias) + BN2 + ReLU, channel-major output
    _zero_border(pad2, Hh, Wh, Cmid)
    pad2[pl.ds(1, Hh), pl.ds(1, Wh), :] = h1.reshape(Hh, Wh, Cmid)
    _im2col_3x3(pad2, patch2, Hh, Wh, Cmid)
    acc2 = jax.lax.dot_general(                            # (Cout, M) = w2 @ patch^T
        w2_ref[...], patch2[...],
        dimension_numbers=(((1,), (1,)), ((), ())),
        preferred_element_type=jnp.float32)
    out = jnp.maximum(acc2 + b2_ref[...], 0.0)             # (Cout, M)
    o_ref[0] = out


def down_forward(x_nchw, w1_oihw, g1, be1, m1, v1, w2_oihw, g2, be2, m2, v2,
                 eps=1e-5):
    """Pallas implementation of Down.forward (eval-mode BN). NCHW in, NCHW out."""
    N, Cin, H, W = x_nchw.shape
    assert H % 2 == 0 and W % 2 == 0, "MaxPool2d(2) path assumes even H and W"
    Hh, Wh = H // 2, W // 2
    M = Hh * Wh
    Cmid = w1_oihw.shape[0]
    Cout = w2_oihw.shape[0]

    # NCHW -> NHWC, then a FREE reshape grouping each horizontal pixel pair with the
    # channel dim; the kernel undoes the grouping with cheap static lane slices.
    x = jnp.transpose(x_nchw, (0, 2, 3, 1)).astype(jnp.float32)   # (N, H, W, Cin)
    x = x.reshape(N, H, Wh, 2 * Cin)

    # Fold eval-mode BatchNorm into per-channel scale / bias, then fold the scale
    # directly into the conv weights (per output channel).
    sc1 = (g1 / jnp.sqrt(v1 + eps)).astype(jnp.float32)
    bi1 = (be1 - m1 * sc1).astype(jnp.float32)
    sc2 = (g2 / jnp.sqrt(v2 + eps)).astype(jnp.float32)
    bi2 = (be2 - m2 * sc2).astype(jnp.float32)

    # Flatten conv weights so each 3x3 conv is a single contraction.
    #   w1: (9*Cin, Cmid),  row order (dy, dx, cin)  -- matches im2col packing
    #   w2: (Cout, 9*Cmid), col order (dy, dx, cmid) -- used as w2 @ patch^T
    w1 = jnp.transpose(w1_oihw, (2, 3, 1, 0)).reshape(9 * Cin, Cmid)
    w1 = (w1.astype(jnp.float32) * sc1[None, :])
    w2 = w2_oihw.astype(jnp.float32) * sc2[:, None, None, None]
    w2 = jnp.transpose(w2, (0, 2, 3, 1)).reshape(Cout, 9 * Cmid)

    bi1 = bi1.reshape(1, Cmid)
    bi2 = bi2.reshape(Cout, 1)

    out_flat = pl.pallas_call(
        _down_kernel,
        out_shape=jax.ShapeDtypeStruct((N, Cout, M), jnp.float32),
        grid_spec=pltpu.PrefetchScalarGridSpec(
            num_scalar_prefetch=0,
            grid=(N,),
            in_specs=[
                pl.BlockSpec((1, H, Wh, 2 * Cin), lambda b: (b, 0, 0, 0)),
                pl.BlockSpec((9 * Cin, Cmid), lambda b: (0, 0)),
                pl.BlockSpec((1, Cmid), lambda b: (0, 0)),
                pl.BlockSpec((Cout, 9 * Cmid), lambda b: (0, 0)),
                pl.BlockSpec((Cout, 1), lambda b: (0, 0)),
            ],
            out_specs=pl.BlockSpec((1, Cout, M), lambda b: (b, 0, 0)),
            scratch_shapes=[
                pltpu.VMEM((Hh + 2, Wh + 2, Cin), jnp.float32),
                pltpu.VMEM((Hh + 2, Wh + 2, Cmid), jnp.float32),
                pltpu.VMEM((M, 9 * Cin), jnp.float32),
                pltpu.VMEM((M, 9 * Cmid), jnp.float32),
            ],
        ),
        compiler_params=pltpu.CompilerParams(
            dimension_semantics=("parallel",)),
    )(x, w1, bi1, w2, bi2)

    # (N, Cout, Hh*Wh) -> NCHW with a free reshape (no output transpose pass).
    return out_flat.reshape(N, Cout, Hh, Wh)


def down_reference(x_nchw, w1, g1, be1, m1, v1, w2, g2, be2, m2, v2, eps=1e-5):
    """Pure-JAX reference (NCHW, matching PyTorch eval-mode semantics)."""
    N, C, H, W = x_nchw.shape
    xp = x_nchw.reshape(N, C, H // 2, 2, W // 2, 2).max(axis=(3, 5))

    def conv_bn_relu(x, w, g, be, m, v):
        y = jax.lax.conv_general_dilated(
            x, w, window_strides=(1, 1), padding="SAME",
            dimension_numbers=("NCHW", "OIHW", "NCHW"))
        s = g / jnp.sqrt(v + eps)
        y = y * s[None, :, None, None] + (be - m * s)[None, :, None, None]
        return jnp.maximum(y, 0.0)

    h = conv_bn_relu(xp, w1, g1, be1, m1, v1)
    return conv_bn_relu(h, w2, g2, be2, m2, v2)


if __name__ == "__main__":
    N, Cin, Cout, H, W = 2, 4, 8, 16, 16
    Cmid = Cout  # DoubleConv default: mid_channels = out_channels

    key = jax.random.PRNGKey(0)
    ks = jax.random.split(key, 11)

    x = jax.random.normal(ks[0], (N, Cin, H, W), jnp.float32)

    # Deterministic synthetic parameters (shapes from the module __init__).
    w1 = 0.1 * jax.random.normal(ks[1], (Cmid, Cin, 3, 3), jnp.float32)
    g1 = 1.0 + 0.1 * jax.random.normal(ks[2], (Cmid,), jnp.float32)
    be1 = 0.1 * jax.random.normal(ks[3], (Cmid,), jnp.float32)
    m1 = 0.1 * jax.random.normal(ks[4], (Cmid,), jnp.float32)
    v1 = 0.5 + jax.random.uniform(ks[5], (Cmid,), jnp.float32)

    w2 = 0.1 * jax.random.normal(ks[6], (Cout, Cmid, 3, 3), jnp.float32)
    g2 = 1.0 + 0.1 * jax.random.normal(ks[7], (Cout,), jnp.float32)
    be2 = 0.1 * jax.random.normal(ks[8], (Cout,), jnp.float32)
    m2 = 0.1 * jax.random.normal(ks[9], (Cout,), jnp.float32)
    v2 = 0.5 + jax.random.uniform(ks[10], (Cout,), jnp.float32)

    out = down_forward(x, w1, g1, be1, m1, v1, w2, g2, be2, m2, v2)
    jax.block_until_ready(out)

    ref = down_reference(x, w1, g1, be1, m1, v1, w2, g2, be2, m2, v2)

    assert out.shape == (N, Cout, H // 2, W // 2), out.shape
    assert jnp.allclose(out, ref, atol=1e-3, rtol=1e-3), float(
        jnp.max(jnp.abs(out - ref)))

    print("KERNEL_OK")
</pallas_src>

<mosaic_0001>
module attributes {stable_mosaic.version = 11 : i64} {
  func.func @_down_kernel(%arg0: i32, %arg1: memref<1x16x8x8xf32, #tpu.memory_space<vmem>>, %arg2: memref<36x8xf32, #tpu.memory_space<vmem>>, %arg3: memref<1x8xf32, #tpu.memory_space<vmem>>, %arg4: memref<8x72xf32, #tpu.memory_space<vmem>>, %arg5: memref<8x1xf32, #tpu.memory_space<vmem>>, %arg6: memref<1x8x64xf32, #tpu.memory_space<vmem>>, %arg7: memref<10x10x4xf32, #tpu.memory_space<vmem>>, %arg8: memref<10x10x8xf32, #tpu.memory_space<vmem>>, %arg9: memref<64x36xf32, #tpu.memory_space<vmem>>, %arg10: memref<64x72xf32, #tpu.memory_space<vmem>>) attributes {dimension_semantics = [#tpu.dimension_semantics<parallel>], iteration_bounds = array<i64: 2>, scalar_prefetch = 0 : i64, scratch_operands = 4 : i64, tpu.core_type = #tpu.core_type<tc>, window_params = [{transform_indices = @transform_0, window_bounds = array<i64: 1, 16, 8, 8>}, {pipeline_mode = #tpu.pipeline_mode<synchronous>, transform_indices = @transform_1, window_bounds = array<i64: 36, 8>}, {pipeline_mode = #tpu.pipeline_mode<synchronous>, transform_indices = @transform_2, window_bounds = array<i64: 1, 8>}, {pipeline_mode = #tpu.pipeline_mode<synchronous>, transform_indices = @transform_3, window_bounds = array<i64: 8, 72>}, {pipeline_mode = #tpu.pipeline_mode<synchronous>, transform_indices = @transform_4, window_bounds = array<i64: 8, 1>}, {transform_indices = @transform_5, window_bounds = array<i64: 1, 8, 64>}]} {
    %c0 = arith.constant 0 : index
    %c0_0 = arith.constant 0 : index
    %c0_1 = arith.constant 0 : index
    %c0_2 = arith.constant 0 : index
    %0 = vector.load %arg1[%c0, %c0_0, %c0_1, %c0_2] : memref<1x16x8x8xf32, #tpu.memory_space<vmem>>, vector<1x16x8x8xf32>
    %1 = vector.shape_cast %0 : vector<1x16x8x8xf32> to vector<16x8x8xf32>
    %2 = vector.extract_strided_slice %1 {offsets = [0, 0, 0], sizes = [16, 8, 4], strides = [1, 1, 1]} : vector<16x8x8xf32> to vector<16x8x4xf32>
    %3 = vector.extract_strided_slice %1 {offsets = [0, 0, 4], sizes = [16, 8, 4], strides = [1, 1, 1]} : vector<16x8x8xf32> to vector<16x8x4xf32>
    %4 = arith.maximumf %2, %3 : vector<16x8x4xf32>
    %5 = vector.shape_cast %4 : vector<16x8x4xf32> to vector<8x2x8x4xf32>
    %6 = vector.extract_strided_slice %5 {offsets = [0, 0, 0, 0], sizes = [8, 1, 8, 4], strides = [1, 1, 1, 1]} : vector<8x2x8x4xf32> to vector<8x1x8x4xf32>
    %7 = vector.shape_cast %6 : vector<8x1x8x4xf32> to vector<8x8x4xf32>
    %8 = vector.extract_strided_slice %5 {offsets = [0, 1, 0, 0], sizes = [8, 1, 8, 4], strides = [1, 1, 1, 1]} : vector<8x2x8x4xf32> to vector<8x1x8x4xf32>
    %9 = vector.shape_cast %8 : vector<8x1x8x4xf32> to vector<8x8x4xf32>
    %10 = arith.maximumf %7, %9 : vector<8x8x4xf32>
    %cst = arith.constant 0.000000e+00 : f32
    %11 = vector.broadcast %cst : f32 to vector<1x10x4xf32>
    %c0_3 = arith.constant 0 : index
    %c0_4 = arith.constant 0 : index
    %c0_5 = arith.constant 0 : index
    %12 = vector.load %arg7[%c0_3, %c0_4, %c0_5] : memref<10x10x4xf32, #tpu.memory_space<vmem>>, vector<1x10x4xf32>
    tpu.vector_store %arg7[%c0_3, %c0_4, %c0_5], %11 {strides = array<i32>} : memref<10x10x4xf32, #tpu.memory_space<vmem>>, vector<1x10x4xf32>,
    %cst_6 = arith.constant 0.000000e+00 : f32
    %13 = vector.broadcast %cst_6 : f32 to vector<1x10x4xf32>
    %c9 = arith.constant 9 : index
    %c0_7 = arith.constant 0 : index
    %c0_8 = arith.constant 0 : index
    %14 = vector.load %arg7[%c9, %c0_7, %c0_8] : memref<10x10x4xf32, #tpu.memory_space<vmem>>, vector<1x10x4xf32>
    tpu.vector_store %arg7[%c9, %c0_7, %c0_8], %13 {strides = array<i32>} : memref<10x10x4xf32, #tpu.memory_space<vmem>>, vector<1x10x4xf32>,
    %cst_9 = arith.constant 0.000000e+00 : f32
    %15 = vector.broadcast %cst_9 : f32 to vector<8x1x4xf32>
    %c1 = arith.constant 1 : index
    %c0_10 = arith.constant 0 : index
    %c0_11 = arith.constant 0 : index
    %16 = vector.load %arg7[%c1, %c0_10, %c0_11] : memref<10x10x4xf32, #tpu.memory_space<vmem>>, vector<8x1x4xf32>
    tpu.vector_store %arg7[%c1, %c0_10, %c0_11], %15 {strides = array<i32>} : memref<10x10x4xf32, #tpu.memory_space<vmem>>, vector<8x1x4xf32>,
    %cst_12 = arith.constant 0.000000e+00 : f32
    %17 = vector.broadcast %cst_12 : f32 to vector<8x1x4xf32>
    %c1_13 = arith.constant 1 : index
    %c9_14 = arith.constant 9 : index
    %c0_15 = arith.constant 0 : index
    %18 = vector.load %arg7[%c1_13, %c9_14, %c0_15] : memref<10x10x4xf32, #tpu.memory_space<vmem>>, vector<8x1x4xf32>
    tpu.vector_store %arg7[%c1_13, %c9_14, %c0_15], %17 {strides = array<i32>} : memref<10x10x4xf32, #tpu.memory_space<vmem>>, vector<8x1x4xf32>,
    %c1_16 = arith.constant 1 : index
    %c1_17 = arith.constant 1 : index
    %c0_18 = arith.constant 0 : index
    %19 = vector.load %arg7[%c1_16, %c1_17, %c0_18] : memref<10x10x4xf32, #tpu.memory_space<vmem>>, vector<8x8x4xf32>
    tpu.vector_store %arg7[%c1_16, %c1_17, %c0_18], %10 {strides = array<i32>} : memref<10x10x4xf32, #tpu.memory_space<vmem>>, vector<8x8x4xf32>,
    %c0_19 = arith.constant 0 : index
    %c0_20 = arith.constant 0 : index
    %c0_21 = arith.constant 0 : index
    %20 = vector.load %arg7[%c0_19, %c0_20, %c0_21] : memref<10x10x4xf32, #tpu.memory_space<vmem>>, vector<8x8x4xf32>
    %21 = vector.shape_cast %20 : vector<8x8x4xf32> to vector<64x4xf32>
    %c0_22 = arith.constant 0 : index
    %c0_23 = arith.constant 0 : index
    %22 = vector.load %arg9[%c0_22, %c0_23] : memref<64x36xf32, #tpu.memory_space<vmem>>, vector<64x4xf32>
    tpu.vector_store %arg9[%c0_22, %c0_23], %21 {strides = array<i32>} : memref<64x36xf32, #tpu.memory_space<vmem>>, vector<64x4xf32>,
    %c0_24 = arith.constant 0 : index
    %c1_25 = arith.constant 1 : index
    %c0_26 = arith.constant 0 : index
    %23 = vector.load %arg7[%c0_24, %c1_25, %c0_26] : memref<10x10x4xf32, #tpu.memory_space<vmem>>, vector<8x8x4xf32>
    %24 = vector.shape_cast %23 : vector<8x8x4xf32> to vector<64x4xf32>
    %c0_27 = arith.constant 0 : index
    %c4 = arith.constant 4 : index
    %25 = vector.load %arg9[%c0_27, %c4] : memref<64x36xf32, #tpu.memory_space<vmem>>, vector<64x4xf32>
    tpu.vector_store %arg9[%c0_27, %c4], %24 {strides = array<i32>} : memref<64x36xf32, #tpu.memory_space<vmem>>, vector<64x4xf32>,
    %c0_28 = arith.constant 0 : index
    %c2 = arith.constant 2 : index
    %c0_29 = arith.constant 0 : index
    %26 = vector.load %arg7[%c0_28, %c2, %c0_29] : memref<10x10x4xf32, #tpu.memory_space<vmem>>, vector<8x8x4xf32>
    %27 = vector.shape_cast %26 : vector<8x8x4xf32> to vector<64x4xf32>
    %c0_30 = arith.constant 0 : index
    %c8 = arith.constant 8 : index
    %28 = vector.load %arg9[%c0_30, %c8] : memref<64x36xf32, #tpu.memory_space<vmem>>, vector<64x4xf32>
    tpu.vector_store %arg9[%c0_30, %c8], %27 {strides = array<i32>} : memref<64x36xf32, #tpu.memory_space<vmem>>, vector<64x4xf32>,
    %c1_31 = arith.constant 1 : index
    %c0_32 = arith.constant 0 : index
    %c0_33 = arith.constant 0 : index
    %29 = vector.load %arg7[%c1_31, %c0_32, %c0_33] : memref<10x10x4xf32, #tpu.memory_space<vmem>>, vector<8x8x4xf32>
    %30 = vector.shape_cast %29 : vector<8x8x4xf32> to vector<64x4xf32>
    %c0_34 = arith.constant 0 : index
    %c12 = arith.constant 12 : index
    %31 = vector.load %arg9[%c0_34, %c12] : memref<64x36xf32, #tpu.memory_space<vmem>>, vector<64x4xf32>
    tpu.vector_store %arg9[%c0_34, %c12], %30 {strides = array<i32>} : memref<64x36xf32, #tpu.memory_space<vmem>>, vector<64x4xf32>,
    %c1_35 = arith.constant 1 : index
    %c1_36 = arith.constant 1 : index
    %c0_37 = arith.constant 0 : index
    %32 = vector.load %arg7[%c1_35, %c1_36, %c0_37] : memref<10x10x4xf32, #tpu.memory_space<vmem>>, vector<8x8x4xf32>
    %33 = vector.shape_cast %32 : vector<8x8x4xf32> to vector<64x4xf32>
    %c0_38 = arith.constant 0 : index
    %c16 = arith.constant 16 : index
    %34 = vector.load %arg9[%c0_38, %c16] : memref<64x36xf32, #tpu.memory_space<vmem>>, vector<64x4xf32>
    tpu.vector_store %arg9[%c0_38, %c16], %33 {strides = array<i32>} : memref<64x36xf32, #tpu.memory_space<vmem>>, vector<64x4xf32>,
    %c1_39 = arith.constant 1 : index
    %c2_40 = arith.constant 2 : index
    %c0_41 = arith.constant 0 : index
    %35 = vector.load %arg7[%c1_39, %c2_40, %c0_41] : memref<10x10x4xf32, #tpu.memory_space<vmem>>, vector<8x8x4xf32>
    %36 = vector.shape_cast %35 : vector<8x8x4xf32> to vector<64x4xf32>
    %c0_42 = arith.constant 0 : index
    %c20 = arith.constant 20 : index
    %37 = vector.load %arg9[%c0_42, %c20] : memref<64x36xf32, #tpu.memory_space<vmem>>, vector<64x4xf32>
    tpu.vector_store %arg9[%c0_42, %c20], %36 {strides = array<i32>} : memref<64x36xf32, #tpu.memory_space<vmem>>, vector<64x4xf32>,
    %c2_43 = arith.constant 2 : index
    %c0_44 = arith.constant 0 : index
    %c0_45 = arith.constant 0 : index
    %38 = vector.load %arg7[%c2_43, %c0_44, %c0_45] : memref<10x10x4xf32, #tpu.memory_space<vmem>>, vector<8x8x4xf32>
    %39 = vector.shape_cast %38 : vector<8x8x4xf32> to vector<64x4xf32>
    %c0_46 = arith.constant 0 : index
    %c24 = arith.constant 24 : index
    %40 = vector.load %arg9[%c0_46, %c24] : memref<64x36xf32, #tpu.memory_space<vmem>>, vector<64x4xf32>
    tpu.vector_store %arg9[%c0_46, %c24], %39 {strides = array<i32>} : memref<64x36xf32, #tpu.memory_space<vmem>>, vector<64x4xf32>,
    %c2_47 = arith.constant 2 : index
    %c1_48 = arith.constant 1 : index
    %c0_49 = arith.constant 0 : index
    %41 = vector.load %arg7[%c2_47, %c1_48, %c0_49] : memref<10x10x4xf32, #tpu.memory_space<vmem>>, vector<8x8x4xf32>
    %42 = vector.shape_cast %41 : vector<8x8x4xf32> to vector<64x4xf32>
    %c0_50 = arith.constant 0 : index
    %c28 = arith.constant 28 : index
    %43 = vector.load %arg9[%c0_50, %c28] : memref<64x36xf32, #tpu.memory_space<vmem>>, vector<64x4xf32>
    tpu.vector_store %arg9[%c0_50, %c28], %42 {strides = array<i32>} : memref<64x36xf32, #tpu.memory_space<vmem>>, vector<64x4xf32>,
    %c2_51 = arith.constant 2 : index
    %c2_52 = arith.constant 2 : index
    %c0_53 = arith.constant 0 : index
    %44 = vector.load %arg7[%c2_51, %c2_52, %c0_53] : memref<10x10x4xf32, #tpu.memory_space<vmem>>, vector<8x8x4xf32>
    %45 = vector.shape_cast %44 : vector<8x8x4xf32> to vector<64x4xf32>
    %c0_54 = arith.constant 0 : index
    %c32 = arith.constant 32 : index
    %46 = vector.load %arg9[%c0_54, %c32] : memref<64x36xf32, #tpu.memory_space<vmem>>, vector<64x4xf32>
    tpu.vector_store %arg9[%c0_54, %c32], %45 {strides = array<i32>} : memref<64x36xf32, #tpu.memory_space<vmem>>, vector<64x4xf32>,
    %c0_55 = arith.constant 0 : index
    %c0_56 = arith.constant 0 : index
    %47 = vector.load %arg9[%c0_55, %c0_56] : memref<64x36xf32, #tpu.memory_space<vmem>>, vector<64x36xf32>
    %c0_57 = arith.constant 0 : index
    %c0_58 = arith.constant 0 : index
    %48 = vector.load %arg2[%c0_57, %c0_58] : memref<36x8xf32, #tpu.memory_space<vmem>>, vector<36x8xf32>
    %cst_59 = arith.constant dense<0.000000e+00> : vector<64x8xf32>
    %49 = tpu.matmul %47, %48, %cst_59 {dimension_numbers = #tpu.dot_dimension_numbers<[1], [0], [0], [1], [0, 0, 1, 1], [], []>} : vector<64x36xf32>, vector<36x8xf32>, vector<64x8xf32> -> vector<64x8xf32>
    %c0_60 = arith.constant 0 : index
    %c0_61 = arith.constant 0 : index
    %50 = vector.load %arg3[%c0_60, %c0_61] : memref<1x8xf32, #tpu.memory_space<vmem>>, vector<1x8xf32>
    %51 = vector.broadcast %50 : vector<1x8xf32> to vector<64x8xf32>
    %52 = arith.addf %49, %51 : vector<64x8xf32>
    %cst_62 = arith.constant 0.000000e+00 : f32
    %53 = vector.broadcast %cst_62 : f32 to vector<64x8xf32>
    %54 = arith.maximumf %52, %53 : vector<64x8xf32>
    %cst_63 = arith.constant 0.000000e+00 : f32
    %55 = vector.broadcast %cst_63 : f32 to vector<1x10x8xf32>
    %c0_64 = arith.constant 0 : index
    %c0_65 = arith.constant 0 : index
    %c0_66 = arith.constant 0 : index
    %56 = vector.load %arg8[%c0_64, %c0_65, %c0_66] : memref<10x10x8xf32, #tpu.memory_space<vmem>>, vector<1x10x8xf32>
    tpu.vector_store %arg8[%c0_64, %c0_65, %c0_66], %55 {strides = array<i32>} : memref<10x10x8xf32, #tpu.memory_space<vmem>>, vector<1x10x8xf32>,
    %cst_67 = arith.constant 0.000000e+00 : f32
    %57 = vector.broadcast %cst_67 : f32 to vector<1x10x8xf32>
    %c9_68 = arith.constant 9 : index
    %c0_69 = arith.constant 0 : index
    %c0_70 = arith.constant 0 : index
    %58 = vector.load %arg8[%c9_68, %c0_69, %c0_70] : memref<10x10x8xf32, #tpu.memory_space<vmem>>, vector<1x10x8xf32>
    tpu.vector_store %arg8[%c9_68, %c0_69, %c0_70], %57 {strides = array<i32>} : memref<10x10x8xf32, #tpu.memory_space<vmem>>, vector<1x10x8xf32>,
    %cst_71 = arith.constant 0.000000e+00 : f32
    %59 = vector.broadcast %cst_71 : f32 to vector<8x1x8xf32>
    %c1_72 = arith.constant 1 : index
    %c0_73 = arith.constant 0 : index
    %c0_74 = arith.constant 0 : index
    %60 = vector.load %arg8[%c1_72, %c0_73, %c0_74] : memref<10x10x8xf32, #tpu.memory_space<vmem>>, vector<8x1x8xf32>
    tpu.vector_store %arg8[%c1_72, %c0_73, %c0_74], %59 {strides = array<i32>} : memref<10x10x8xf32, #tpu.memory_space<vmem>>, vector<8x1x8xf32>,
    %cst_75 = arith.constant 0.000000e+00 : f32
    %61 = vector.broadcast %cst_75 : f32 to vector<8x1x8xf32>
    %c1_76 = arith.constant 1 : index
    %c9_77 = arith.constant 9 : index
    %c0_78 = arith.constant 0 : index
    %62 = vector.load %arg8[%c1_76, %c9_77, %c0_78] : memref<10x10x8xf32, #tpu.memory_space<vmem>>, vector<8x1x8xf32>
    tpu.vector_store %arg8[%c1_76, %c9_77, %c0_78], %61 {strides = array<i32>} : memref<10x10x8xf32, #tpu.memory_space<vmem>>, vector<8x1x8xf32>,
    %63 = vector.shape_cast %54 : vector<64x8xf32> to vector<8x8x8xf32>
    %c1_79 = arith.constant 1 : index
    %c1_80 = arith.constant 1 : index
    %c0_81 = arith.constant 0 : index
    %64 = vector.load %arg8[%c1_79, %c1_80, %c0_81] : memref<10x10x8xf32, #tpu.memory_space<vmem>>, vector<8x8x8xf32>
    tpu.vector_store %arg8[%c1_79, %c1_80, %c0_81], %63 {strides = array<i32>} : memref<10x10x8xf32, #tpu.memory_space<vmem>>, vector<8x8x8xf32>,
    %c0_82 = arith.constant 0 : index
    %c0_83 = arith.constant 0 : index
    %c0_84 = arith.constant 0 : index
    %65 = vector.load %arg8[%c0_82, %c0_83, %c0_84] : memref<10x10x8xf32, #tpu.memory_space<vmem>>, vector<8x8x8xf32>
    %66 = vector.shape_cast %65 : vector<8x8x8xf32> to vector<64x8xf32>
    %c0_85 = arith.constant 0 : index
    %c0_86 = arith.constant 0 : index
    %67 = vector.load %arg10[%c0_85, %c0_86] : memref<64x72xf32, #tpu.memory_space<vmem>>, vector<64x8xf32>
    tpu.vector_store %arg10[%c0_85, %c0_86], %66 {strides = array<i32>} : memref<64x72xf32, #tpu.memory_space<vmem>>, vector<64x8xf32>,
    %c0_87 = arith.constant 0 : index
    %c1_88 = arith.constant 1 : index
    %c0_89 = arith.constant 0 : index
    %68 = vector.load %arg8[%c0_87, %c1_88, %c0_89] : memref<10x10x8xf32, #tpu.memory_space<vmem>>, vector<8x8x8xf32>
    %69 = vector.shape_cast %68 : vector<8x8x8xf32> to vector<64x8xf32>
    %c0_90 = arith.constant 0 : index
    %c8_91 = arith.constant 8 : index
    %70 = vector.load %arg10[%c0_90, %c8_91] : memref<64x72xf32, #tpu.memory_space<vmem>>, vector<64x8xf32>
    tpu.vector_store %arg10[%c0_90, %c8_91], %69 {strides = array<i32>} : memref<64x72xf32, #tpu.memory_space<vmem>>, vector<64x8xf32>,
    %c0_92 = arith.constant 0 : index
    %c2_93 = arith.constant 2 : index
    %c0_94 = arith.constant 0 : index
    %71 = vector.load %arg8[%c0_92, %c2_93, %c0_94] : memref<10x10x8xf32, #tpu.memory_space<vmem>>, vector<8x8x8xf32>
    %72 = vector.shape_cast %71 : vector<8x8x8xf32> to vector<64x8xf32>
    %c0_95 = arith.constant 0 : index
    %c16_96 = arith.constant 16 : index
    %73 = vector.load %arg10[%c0_95, %c16_96] : memref<64x72xf32, #tpu.memory_space<vmem>>, vector<64x8xf32>
    tpu.vector_store %arg10[%c0_95, %c16_96], %72 {strides = array<i32>} : memref<64x72xf32, #tpu.memory_space<vmem>>, vector<64x8xf32>,
    %c1_97 = arith.constant 1 : index
    %c0_98 = arith.constant 0 : index
    %c0_99 = arith.constant 0 : index
    %74 = vector.load %arg8[%c1_97, %c0_98, %c0_99] : memref<10x10x8xf32, #tpu.memory_space<vmem>>, vector<8x8x8xf32>
    %75 = vector.shape_cast %74 : vector<8x8x8xf32> to vector<64x8xf32>
    %c0_100 = arith.constant 0 : index
    %c24_101 = arith.constant 24 : index
    %76 = vector.load %arg10[%c0_100, %c24_101] : memref<64x72xf32, #tpu.memory_space<vmem>>, vector<64x8xf32>
    tpu.vector_store %arg10[%c0_100, %c24_101], %75 {strides = array<i32>} : memref<64x72xf32, #tpu.memory_space<vmem>>, vector<64x8xf32>,
    %c1_102 = arith.constant 1 : index
    %c1_103 = arith.constant 1 : index
    %c0_104 = arith.constant 0 : index
    %77 = vector.load %arg8[%c1_102, %c1_103, %c0_104] : memref<10x10x8xf32, #tpu.memory_space<vmem>>, vector<8x8x8xf32>
    %78 = vector.shape_cast %77 : vector<8x8x8xf32> to vector<64x8xf32>
    %c0_105 = arith.constant 0 : index
    %c32_106 = arith.constant 32 : index
    %79 = vector.load %arg10[%c0_105, %c32_106] : memref<64x72xf32, #tpu.memory_space<vmem>>, vector<64x8xf32>
    tpu.vector_store %arg10[%c0_105, %c32_106], %78 {strides = array<i32>} : memref<64x72xf32, #tpu.memory_space<vmem>>, vector<64x8xf32>,
    %c1_107 = arith.constant 1 : index
    %c2_108 = arith.constant 2 : index
    %c0_109 = arith.constant 0 : index
    %80 = vector.load %arg8[%c1_107, %c2_108, %c0_109] : memref<10x10x8xf32, #tpu.memory_space<vmem>>, vector<8x8x8xf32>
    %81 = vector.shape_cast %80 : vector<8x8x8xf32> to vector<64x8xf32>
    %c0_110 = arith.constant 0 : index
    %c40 = arith.constant 40 : index
    %82 = vector.load %arg10[%c0_110, %c40] : memref<64x72xf32, #tpu.memory_space<vmem>>, vector<64x8xf32>
    tpu.vector_store %arg10[%c0_110, %c40], %81 {strides = array<i32>} : memref<64x72xf32, #tpu.memory_space<vmem>>, vector<64x8xf32>,
    %c2_111 = arith.constant 2 : index
    %c0_112 = arith.constant 0 : index
    %c0_113 = arith.constant 0 : index
    %83 = vector.load %arg8[%c2_111, %c0_112, %c0_113] : memref<10x10x8xf32, #tpu.memory_space<vmem>>, vector<8x8x8xf32>
    %84 = vector.shape_cast %83 : vector<8x8x8xf32> to vector<64x8xf32>
    %c0_114 = arith.constant 0 : index
    %c48 = arith.constant 48 : index
    %85 = vector.load %arg10[%c0_114, %c48] : memref<64x72xf32, #tpu.memory_space<vmem>>, vector<64x8xf32>
    tpu.vector_store %arg10[%c0_114, %c48], %84 {strides = array<i32>} : memref<64x72xf32, #tpu.memory_space<vmem>>, vector<64x8xf32>,
    %c2_115 = arith.constant 2 : index
    %c1_116 = arith.constant 1 : index
    %c0_117 = arith.constant 0 : index
    %86 = vector.load %arg8[%c2_115, %c1_116, %c0_117] : memref<10x10x8xf32, #tpu.memory_space<vmem>>, vector<8x8x8xf32>
    %87 = vector.shape_cast %86 : vector<8x8x8xf32> to vector<64x8xf32>
    %c0_118 = arith.constant 0 : index
    %c56 = arith.constant 56 : index
    %88 = vector.load %arg10[%c0_118, %c56] : memref<64x72xf32, #tpu.memory_space<vmem>>, vector<64x8xf32>
    tpu.vector_store %arg10[%c0_118, %c56], %87 {strides = array<i32>} : memref<64x72xf32, #tpu.memory_space<vmem>>, vector<64x8xf32>,
    %c2_119 = arith.constant 2 : index
    %c2_120 = arith.constant 2 : index
    %c0_121 = arith.constant 0 : index
    %89 = vector.load %arg8[%c2_119, %c2_120, %c0_121] : memref<10x10x8xf32, #tpu.memory_space<vmem>>, vector<8x8x8xf32>
    %90 = vector.shape_cast %89 : vector<8x8x8xf32> to vector<64x8xf32>
    %c0_122 = arith.constant 0 : index
    %c64 = arith.constant 64 : index
    %91 = vector.load %arg10[%c0_122, %c64] : memref<64x72xf32, #tpu.memory_space<vmem>>, vector<64x8xf32>
    tpu.vector_store %arg10[%c0_122, %c64], %90 {strides = array<i32>} : memref<64x72xf32, #tpu.memory_space<vmem>>, vector<64x8xf32>,
    %c0_123 = arith.constant 0 : index
    %c0_124 = arith.constant 0 : index
    %92 = vector.load %arg4[%c0_123, %c0_124] : memref<8x72xf32, #tpu.memory_space<vmem>>, vector<8x72xf32>
    %c0_125 = arith.constant 0 : index
    %c0_126 = arith.constant 0 : index
    %93 = vector.load %arg10[%c0_125, %c0_126] : memref<64x72xf32, #tpu.memory_space<vmem>>, vector<64x72xf32>
    %cst_127 = arith.constant dense<0.000000e+00> : vector<8x64xf32>
    %94 = tpu.matmul %92, %93, %cst_127 {dimension_numbers = #tpu.dot_dimension_numbers<[1], [1], [0], [0], [0, 0, 1, 0], [], []>} : vector<8x72xf32>, vector<64x72xf32>, vector<8x64xf32> -> vector<8x64xf32>
    %c0_128 = arith.constant 0 : index
    %c0_129 = arith.constant 0 : index
    %95 = vector.load %arg5[%c0_128, %c0_129] : memref<8x1xf32, #tpu.memory_space<vmem>>, vector<8x1xf32>
    %96 = vector.broadcast %95 : vector<8x1xf32> to vector<8x64xf32>
    %97 = arith.addf %94, %96 : vector<8x64xf32>
    %cst_130 = arith.constant 0.000000e+00 : f32
    %98 = vector.broadcast %cst_130 : f32 to vector<8x64xf32>
    %99 = arith.maximumf %97, %98 : vector<8x64xf32>
    %c0_131 = arith.constant 0 : index
    %c0_132 = arith.constant 0 : index
    %c0_133 = arith.constant 0 : index
    %100 = vector.load %arg6[%c0_131, %c0_132, %c0_133] : memref<1x8x64xf32, #tpu.memory_space<vmem>>, vector<1x8x64xf32>
    %101 = vector.shape_cast %100 : vector<1x8x64xf32> to vector<8x64xf32>
    %102 = vector.shape_cast %99 : vector<8x64xf32> to vector<1x8x64xf32>
    tpu.vector_store %arg6[%c0_131, %c0_132, %c0_133], %102 {strides = array<i32>} : memref<1x8x64xf32, #tpu.memory_space<vmem>>, vector<1x8x64xf32>,
    return
  }
  func.func @transform_0(%arg0: i32) -> (i32, i32, i32, i32) {
    %c0_i32 = arith.constant 0 : i32
    %c0_i32_0 = arith.constant 0 : i32
    %c0_i32_1 = arith.constant 0 : i32
    %c0_i32_2 = arith.constant 0 : i32
    return %arg0, %c0_i32, %c0_i32_0, %c0_i32_1 : i32, i32, i32, i32
  }
  func.func @transform_1(%arg0: i32) -> (i32, i32) {
    %c0_i32 = arith.constant 0 : i32
    %c0_i32_0 = arith.constant 0 : i32
    %c0_i32_1 = arith.constant 0 : i32
    return %c0_i32, %c0_i32_0 : i32, i32
  }
  func.func @transform_2(%arg0: i32) -> (i32, i32) {
    %c0_i32 = arith.constant 0 : i32
    %c0_i32_0 = arith.constant 0 : i32
    %c0_i32_1 = arith.constant 0 : i32
    return %c0_i32, %c0_i32_0 : i32, i32
  }
  func.func @transform_3(%arg0: i32) -> (i32, i32) {
    %c0_i32 = arith.constant 0 : i32
    %c0_i32_0 = arith.constant 0 : i32
    %c0_i32_1 = arith.constant 0 : i32
    return %c0_i32, %c0_i32_0 : i32, i32
  }
  func.func @transform_4(%arg0: i32) -> (i32, i32) {
    %c0_i32 = arith.constant 0 : i32
    %c0_i32_0 = arith.constant 0 : i32
    %c0_i32_1 = arith.constant 0 : i32
    return %c0_i32, %c0_i32_0 : i32, i32
  }
  func.func @transform_5(%arg0: i32) -> (i32, i32, i32) {
    %c0_i32 = arith.constant 0 : i32
    %c0_i32_0 = arith.constant 0 : i32
    %c0_i32_1 = arith.constant 0 : i32
    return %arg0, %c0_i32, %c0_i32_0 : i32, i32, i32
  }
}

</mosaic_0001>

<bundles_post_ra>
// kernel: tpu_custom_call.1
= control target key start
LH: loop header
LB: loop body
LE: loop exit
PB: predicated region body
PF: predicated region fallthrough
CT: control target
= control target key end

     0   :  { %10 = vsyncpa [#allocation7], 0  ;;  %s2440_s0 = inlined_call_operand.vmem [shape: f32[2,16,8,8], index: 0, kind: input, shape index: {}]   ;;  %s2441_s1 = inlined_call_operand.vmem [shape: f32[36,8], index: 1, kind: input, shape index: {}]   ;;  %s2442_s2 = inlined_call_operand.vmem [shape: f32[1,8], index: 2, kind: input, shape index: {}]   ;;  %s2443_s3 = inlined_call_operand.vmem [shape: f32[8,72], index: 3, kind: input, shape index: {}]   ;;  %s2444_s4 = inlined_call_operand.vmem [shape: f32[8,1], index: 4, kind: input, shape index: {}]   ;;  %s2445_s5 = inlined_call_operand.hbm [shape: f32[2,8,64], index: 5, kind: output, shape index: {}]  }
   0x1   :  { %12 = vsyncpa [#allocation7 + $0x1], 0  ;;  %s1849_s18 = smov 0   ;;  %s1851_s19 = smov 0  }
   0x2   :  { %s1853_s20 = smov 0   ;;  %s1855_s21 = smov 0  }
   0x3 LB: > { %s1870_s22 = sadd.s32 4294967295, %s1799_s21   ;;  %s1562_s23 = sadd.s32 4294967294, %s1799_s21   ;;  %s1799_s21 = sphi %s1855_s21, %s2453_s21   ;;  %s1795_s20 = sphi %s1853_s20, %s2452_s20   ;;  %s1791_s19 = sphi %s1851_s19, %s2451_s19   ;;  %s1787_s18 = sphi %s1849_s18, %s2450_s18  }
   0x4   : > { %s1874_s24 = sadd.s32 1, %s1799_s21   ;;  %s135_s25 = sadd.s32 1, %s1795_s20 }
   0x5   : > { %s132_s26 = ssub.s32 %s1799_s21, %s1874_s24  ;;  %p145_p0 = scmp.ne.s32.totalorder %s1795_s20, %s1791_s19 }
   0x6   : > { %p133_p1 = scmp.eq.s32.totalorder %s132_s26, 0  ;;  %p146_p2 = scmp.eq.s32.totalorder %s1870_s22, 1 }
   0x7   : > { %p151_p3 = scmp.ne.s32.totalorder %s1791_s19, %s1787_s18  ;;  %p152_p4 = scmp.eq.s32.totalorder %s1562_s23, 1 }
   0x8   : > { %s1885_s27 = scalar_select %p133_p1, %s1795_s20, %s135_s25  }
   0x9   : > { %p1887_p5 = por %p146_p2, %p145_p0  ;;  %p1891_p6 = por %p152_p4, %p151_p3 }
   0xa   : > { %p1565_p7 = scmp.ge.s32.totalorder %s1799_s21, 1  ;;  %p190_p8 = scmp.lt.s32.totalorder %s1799_s21, 3 }
   0xc   : > { %p191_p9 = pnand %p1565_p7, %p190_p8 }
   0xd   : > { %p218_p10 = scmp.lt.s32.totalorder (!%p191_p9), %s1870_s22, 1  ;;  %vm327_vm0 = vcmask (!%p191_p9), 31744   ;;  %vm329_vm1 = vcmask (!%p191_p9), 25600   ;;  %v1801_v0 = vmov (!%p191_p9), 0.0   ;;  %vm335_vm2 = vcmask (!%p191_p9), 24576   ;;  %s1802_s10 = smov (!%p191_p9), 124  }
   0xe   : > { %194 = sbr.rel (%p191_p9) target bundleno = 1027 (0x403), region = 40  ;;  %328 = vst.msk [vmem:[#allocation2] sm:$0xff] (!%p191_p9), %vm327_vm0, %v1801_v0  ;;  %332 = vst.msk [vmem:[#allocation2 + $0x90] sm:$0xff] (!%p191_p9), %vm327_vm0, %v1801_v0  ;;  %s1803_s11 = smov (!%p191_p9), 4   ;;  %vm416_vm3 = vcmask (!%p191_p9), 64544   ;;  %vm465_vm4 = vcmask (!%p191_p9), 97344  }
   0xf   : > { %330 = vst.msk [vmem:[#allocation2 + $0x8] sm:$0x3] (!%p191_p9), %vm329_vm1, %v1801_v0  ;;  %333 = vst.msk [vmem:[#allocation2 + $0x98] sm:$0x3] (!%p191_p9), %vm329_vm1, %v1801_v0  ;;  %s1804_s12 = smov (!%p191_p9), 8   ;;  %s1805_s13 = smov (!%p191_p9), 12  }
  0x10   : > { %336 = vst.msk [vmem:[#allocation2 + $0x10] sm:$0x1] (!%p191_p9), %vm335_vm2, %v1801_v0  ;;  %337 = vst.msk [vmem:[#allocation2 + $0x20] sm:$0x1] (!%p191_p9), %vm335_vm2, %v1801_v0  ;;  %s1806_s14 = smov (!%p191_p9), 16   ;;  %s1807_s15 = smov (!%p191_p9), 20  }
  0x11   : > { %338 = vst.msk [vmem:[#allocation2 + $0x30] sm:$0x1] (!%p191_p9), %vm335_vm2, %v1801_v0  ;;  %339 = vst.msk [vmem:[#allocation2 + $0x40] sm:$0x1] (!%p191_p9), %vm335_vm2, %v1801_v0  ;;  %s1808_s16 = smov (!%p191_p9), 24   ;;  %vm814_vm5 = vcmask (!%p191_p9), 1043456  }
  0x12   : > { %340 = vst.msk [vmem:[#allocation2 + $0x50] sm:$0x1] (!%p191_p9), %vm335_vm2, %v1801_v0  ;;  %341 = vst.msk [vmem:[#allocation2 + $0x60] sm:$0x1] (!%p191_p9), %vm335_vm2, %v1801_v0  ;;  %s1810_s23 = smov (!%p191_p9), 32   ;;  %vm514_vm6 = vcmask (!%p191_p9), 130144  }
  0x13   : > { %342 = vst.msk [vmem:[#allocation2 + $0x70] sm:$0x1] (!%p191_p9), %vm335_vm2, %v1801_v0  ;;  %343 = vst.msk [vmem:[#allocation2 + $0x80] sm:$0x1] (!%p191_p9), %vm335_vm2, %v1801_v0  ;;  %vm563_vm7 = vcmask (!%p191_p9), 162944   ;;  %vm612_vm8 = vcmask (!%p191_p9), 195744  }
  0x14   : > { %344 = vst.msk [vmem:[#allocation2 + $0x19] sm:$0x1] (!%p191_p9), %vm335_vm2, %v1801_v0  ;;  %345 = vst.msk [vmem:[#allocation2 + $0x29] sm:$0x1] (!%p191_p9), %vm335_vm2, %v1801_v0  ;;  %vm662_vm9 = vcmask (!%p191_p9), 228544   ;;  %vm711_vm10 = vcmask (!%p191_p9), 261344  }
  0x15   : > { %s219_s30 = scalar_select %p218_p10, %s1870_s22, 1  ;;  %346 = vst.msk [vmem:[#allocation2 + $0x39] sm:$0x1] %vm335_vm2, %v1801_v0  ;;  %347 = vst.msk [vmem:[#allocation2 + $0x49] sm:$0x1] %vm335_vm2, %v1801_v0  ;;  %v360_v19 = vld [vmem:[#allocation2] sm:$0xff] }
  0x16   : > { %348 = vst.msk [vmem:[#allocation2 + $0x59] sm:$0x1] %vm335_vm2, %v1801_v0  ;;  %349 = vst.msk [vmem:[#allocation2 + $0x69] sm:$0x1] %vm335_vm2, %v1801_v0  ;;  %v376_v17 = vld [vmem:[#allocation2 + $0x1] sm:$0xff]  ;;  %vm760_vm11 = vcmask 294144  }
  0x17   : > { %350 = vst.msk [vmem:[#allocation2 + $0x79] sm:$0x1] %vm335_vm2, %v1801_v0  ;;  %351 = vst.msk [vmem:[#allocation2 + $0x89] sm:$0x1] %vm335_vm2, %v1801_v0  ;;  %s1592_s6 = sshll.u32 %s219_s30, 7  ;;  %v425_v18 = vld [vmem:[#allocation2 + $0x2] sm:$0xff] }
  0x18   : > { %s1940_s9 = scalar_lea.vmem %s2440_s0, %s1592_s6  ;;  %368 = vst.msk [vmem:[#allocation4] sm:$0xff] %vm327_vm0, %v360_v19  ;;  %vm789_vm12 = vcmask 293888   ;;  %vm931_vm13 = vcmask 64512   ;;  %vm933_vm14 = vcmask 58368   ;;  %vm939_vm15 = vcmask 57344   ;;  %s1812_s25 = smov 56  }
  0x19   : > { %v223_v1 = vld [vmem:[%s1940_s9] sm:$0xff]  ;;  %v225_v2 = vld [vmem:[%s1940_s9 + $0x10] sm:$0xff]  ;;  %v224_v3 = vld [vmem:[%s1940_s9 + $0x8] sm:$0xff]  ;;  %932 = vst.msk [vmem:[#allocation3] sm:$0xff] %vm931_vm13, %v1801_v0  ;;  %vm1069_vm1 = vcmask 195712   ;;  %s1813_s26 = smov 64  }
  0x1a   : > { %255 = vrot.lane.b32.xlu0 %v223_v1, %s1802_s10  ;;  %259 = vrot.lane.b32.xlu1 %v225_v2, %s1802_s10  ;;  %v226_v4 = vld [vmem:[%s1940_s9 + $0x18] sm:$0xff]  ;;  %v228_v5 = vld [vmem:[%s1940_s9 + $0x28] sm:$0xff]  ;;  %936 = vst.msk [vmem:[#allocation3 + $0x90] sm:$0xff] %vm931_vm13, %v1801_v0  ;;  %s1814_s30 = smov 40   ;;  %vm1816_vm2 = vmmov 0   ;;  %s215_s7 = sand.u32 1, %s1791_s19  }
  0x1b   : > { %v227_v6 = vld [vmem:[%s1940_s9 + $0x20] sm:$0xff]  ;;  %v230_v7 = vld [vmem:[%s1940_s9 + $0x38] sm:$0xff]  ;;  %v229_v8 = vld [vmem:[%s1940_s9 + $0x30] sm:$0xff]  ;;  %934 = vst.msk [vmem:[#allocation3 + $0x8] sm:$0x3] %vm933_vm14, %v1801_v0  ;;  %1653 = vmatprep.mubr.msk.f32.mxu1 %vm1816_vm2, %v1801_v0  ;;  %s1566_s8 = sshll.u32 %s215_s7, 3 }
  0x1c   : > { %v232_v9 = vld [vmem:[%s1940_s9 + $0x48] sm:$0xff]  ;;  %v231_v10 = vld [vmem:[%s1940_s9 + $0x40] sm:$0xff]  ;;  %v1953_v11 = vld [vmem:[%s1940_s9 + $0x58] sm:$0xff]  ;;  %937 = vst.msk [vmem:[#allocation3 + $0x98] sm:$0x3] %vm933_vm14, %v1801_v0 }
  0x1d   : > { %v1956_v12 = vld [vmem:[%s1940_s9 + $0x50] sm:$0xff]  ;;  %v1961_v13 = vld [vmem:[%s1940_s9 + $0x68] sm:$0xff]  ;;  %v1964_v14 = vld [vmem:[%s1940_s9 + $0x60] sm:$0xff]  ;;  %941 = vst.msk [vmem:[#allocation3 + $0x20] sm:$0x1] %vm939_vm15, %v1801_v0 }
  0x1e   : > { %257 = vrot.lane.b32.xlu0 %v224_v3, %s1802_s10  ;;  %261 = vrot.lane.b32.xlu1 %v226_v4, %s1802_s10  ;;  %v1969_v15 = vld [vmem:[%s1940_s9 + $0x78] sm:$0xff]  ;;  %v1972_v16 = vld [vmem:[%s1940_s9 + $0x70] sm:$0xff]  ;;  %s1809_s9 = smov 28   ;;  %940 = vst.msk [vmem:[#allocation3 + $0x10] sm:$0x1] %vm939_vm15, %v1801_v0 }
  0x1f   : > { %942 = vst.msk [vmem:[#allocation3 + $0x30] sm:$0x1] %vm939_vm15, %v1801_v0  ;;  %943 = vst.msk [vmem:[#allocation3 + $0x40] sm:$0x1] %vm939_vm15, %v1801_v0 }
  0x20   : > { %944 = vst.msk [vmem:[#allocation3 + $0x50] sm:$0x1] %vm939_vm15, %v1801_v0  ;;  %945 = vst.msk [vmem:[#allocation3 + $0x60] sm:$0x1] %vm939_vm15, %v1801_v0 }
  0x21   : > { %946 = vst.msk [vmem:[#allocation3 + $0x70] sm:$0x1] %vm939_vm15, %v1801_v0  ;;  %947 = vst.msk [vmem:[#allocation3 + $0x80] sm:$0x1] %vm939_vm15, %v1801_v0 }
  0x22   : > { %265 = vrot.lane.b32.xlu1 %v228_v5, %s1802_s10  ;;  %263 = vrot.lane.b32.xlu0 %v227_v6, %s1802_s10  ;;  %948 = vst.msk [vmem:[#allocation3 + $0x19] sm:$0x1] %vm939_vm15, %v1801_v0  ;;  %949 = vst.msk [vmem:[#allocation3 + $0x29] sm:$0x1] %vm939_vm15, %v1801_v0 }
  0x23   : > { %950 = vst.msk [vmem:[#allocation3 + $0x39] sm:$0x1] %vm939_vm15, %v1801_v0  ;;  %951 = vst.msk [vmem:[#allocation3 + $0x49] sm:$0x1] %vm939_vm15, %v1801_v0 }
  0x24   : > { %952 = vst.msk [vmem:[#allocation3 + $0x59] sm:$0x1] %vm939_vm15, %v1801_v0  ;;  %953 = vst.msk [vmem:[#allocation3 + $0x69] sm:$0x1] %vm939_vm15, %v1801_v0 }
  0x25   : > { %954 = vst.msk [vmem:[#allocation3 + $0x79] sm:$0x1] %vm939_vm15, %v1801_v0  ;;  %955 = vst.msk [vmem:[#allocation3 + $0x89] sm:$0x1] %vm939_vm15, %v1801_v0 }
  0x26   : > { %269 = vrot.lane.b32.xlu1 %v230_v7, %s1802_s10  ;;  %267 = vrot.lane.b32.xlu0 %v229_v8, %s1802_s10 }
  0x2a   : > { %273 = vrot.lane.b32.xlu1 %v232_v9, %s1802_s10  ;;  %271 = vrot.lane.b32.xlu0 %v231_v10, %s1802_s10 }
  0x2e   : > { %277 = vrot.lane.b32.xlu1 %v1953_v11, %s1802_s10  ;;  %275 = vrot.lane.b32.xlu0 %v1956_v12, %s1802_s10 }
  0x32   : > { %281 = vrot.lane.b32.xlu1 %v1961_v13, %s1802_s10  ;;  %279 = vrot.lane.b32.xlu0 %v1964_v14, %s1802_s10 }
  0x36   : > { %285 = vrot.lane.b32.xlu1 %v1969_v15, %s1802_s10  ;;  %283 = vrot.lane.b32.xlu0 %v1972_v16, %s1802_s10  ;;  %s217_s10 = scalar_lea.vmem [#allocation6], %s1566_s8 }
  0x37   : > { %s1503_s17 = sshll.u32 %s217_s10, 4  ;;  %s2400_s17 = int_to_ptr.vmem [resolvable:$true] %s1503_s17 }
  0x3a   : > { %392 = vrot.lane.b32.xlu0 %v376_v17, %s1803_s11 }
  0x3e   : > { %441 = vrot.lane.b32.xlu0 %v425_v18, %s1804_s12  ;;  %v781_v18 = vld [vmem:[%s2441_s1 + $0x20] sm:$0xf] }
  0x8c   : > { %v256_v20 = vpop.permute.xlu0 %255  ;;  %v260_v21 = vpop.permute.xlu1 %259 }
  0x8d   : > { %v305_v22 = vmax.f32 %v225_v2, %v260_v21  ;;  %v303_v25 = vmax.f32 %v223_v1, %v256_v20 }
  0x90   : > { %v258_v23 = vpop.permute.xlu0 %257  ;;  %v262_v24 = vpop.permute.xlu1 %261 }
  0x91   : > { %v304_v26 = vmax.f32 %v224_v3, %v258_v23  ;;  %v306_v27 = vmax.f32 %v226_v4, %v262_v24 }
  0x93   : > { %v319_v28 = vmax.f32 %v303_v25, %v304_v26  ;;  %v320_v29 = vmax.f32 %v305_v22, %v306_v27 }
  0x94   : > { %v266_v30 = vpop.permute.xlu1 %265  ;;  %v264_v31 = vpop.permute.xlu0 %263 }
  0x95   : > { %352 = vst.msk [vmem:[#allocation2 + $0x11] sm:$0xff] %vm327_vm0, %v319_v28  ;;  %353 = vst.msk [vmem:[#allocation2 + $0x21] sm:$0xff] %vm327_vm0, %v320_v29  ;;  %v308_v32 = vmax.f32 %v228_v5, %v266_v30  ;;  %v307_v33 = vmax.f32 %v227_v6, %v264_v31  ;;  %v629_v30 = vld [vmem:[#allocation2 + $0x90] sm:$0xff] }
  0x97   : > { %v321_v34 = vmax.f32 %v307_v33, %v308_v32  ;;  %v678_v33 = vld [vmem:[#allocation2 + $0x91] sm:$0xff] }
  0x98   : > { %v270_v35 = vpop.permute.xlu1 %269  ;;  %v268_v36 = vpop.permute.xlu0 %267 }
  0x99   : > { %354 = vst.msk [vmem:[#allocation2 + $0x31] sm:$0xff] %vm327_vm0, %v321_v34  ;;  %v310_v37 = vmax.f32 %v230_v7, %v270_v35  ;;  %v309_v38 = vmax.f32 %v229_v8, %v268_v36  ;;  %v727_v36 = vld [vmem:[#allocation2 + $0x92] sm:$0xff] }
  0x9b   : > { %v322_v39 = vmax.f32 %v309_v38, %v310_v37 }
  0x9c   : > { %v474_v40 = vld [vmem:[#allocation2 + $0x10] sm:$0xff]  ;;  %v274_v42 = vpop.permute.xlu1 %273  ;;  %v272_v43 = vpop.permute.xlu0 %271  ;;  %v475_v44 = vld [vmem:[#allocation2 + $0x20] sm:$0xff] }
  0x9d   : > { %v377_v41 = vld [vmem:[#allocation2 + $0x11] sm:$0xff]  ;;  %490 = vrot.lane.b32.xlu0 %v474_v40, %s1805_s13  ;;  %355 = vst.msk [vmem:[#allocation2 + $0x41] sm:$0xff] %vm327_vm0, %v322_v39  ;;  %v312_v45 = vmax.f32 %v232_v9, %v274_v42  ;;  %v311_v46 = vmax.f32 %v231_v10, %v272_v43  ;;  %369 = vst.msk [vmem:[#allocation4 + $0x8] sm:$0xff] %vm327_vm0, %v474_v40  ;;  %v573_v61 = vld [vmem:[#allocation2 + $0x22] sm:$0xff] }
  0x9e   : > { %394 = vrot.lane.b32.xlu1 %v377_v41, %s1803_s11  ;;  %370 = vst.msk [vmem:[#allocation4 + $0x10] sm:$0xff] %vm327_vm0, %v475_v44  ;;  %v426_v48 = vld [vmem:[#allocation2 + $0x12] sm:$0xff]  ;;  %v524_v62 = vld [vmem:[#allocation2 + $0x21] sm:$0xff] }
  0x9f   : > { %v323_v47 = vmax.f32 %v311_v46, %v312_v45 }
  0xa0   : > { %v1987_v49 = vld [vmem:[#allocation2 + $0x30] sm:$0xff]  ;;  %v278_v50 = vpop.permute.xlu1 %277  ;;  %v276_v51 = vpop.permute.xlu0 %275 }
  0xa1   : > { %539 = vrot.lane.b32.xlu0 %v377_v41, %s1806_s14  ;;  %356 = vst.msk [vmem:[#allocation2 + $0x51] sm:$0xff] %vm327_vm0, %v323_v47  ;;  %v314_v52 = vmax.f32 %v1953_v11, %v278_v50  ;;  %v313_v53 = vmax.f32 %v1956_v12, %v276_v51  ;;  %371 = vst.msk [vmem:[#allocation4 + $0x18] sm:$0xff] %vm327_vm0, %v1987_v49  ;;  %v379_v5 = vld [vmem:[#allocation2 + $0x31] sm:$0xff]  ;;  %v777_v11 = vld [vmem:[%s2441_s1] sm:$0xff] }
  0xa2   : > { %443 = vrot.lane.b32.xlu1 %v426_v48, %s1804_s12  ;;  %v778_v12 = vld [vmem:[%s2441_s1 + $0x8] sm:$0xff] }
  0xa3   : > { %v324_v54 = vmax.f32 %v313_v53, %v314_v52 }
  0xa4   : > { %v1996_v55 = vld [vmem:[#allocation2 + $0x40] sm:$0xff]  ;;  %v282_v56 = vpop.permute.xlu1 %281  ;;  %v280_v57 = vpop.permute.xlu0 %279 }
  0xa5   : > { %588 = vrot.lane.b32.xlu0 %v426_v48, %s1807_s15  ;;  %357 = vst.msk [vmem:[#allocation2 + $0x61] sm:$0xff] %vm327_vm0, %v324_v54  ;;  %v316_v58 = vmax.f32 %v1961_v13, %v282_v56  ;;  %v315_v59 = vmax.f32 %v1964_v14, %v280_v57  ;;  %372 = vst.msk [vmem:[#allocation4 + $0x20] sm:$0xff] %vm327_vm0, %v1996_v55  ;;  %v1656_v13 = vpack.c.bf16 %v778_v12, %v777_v11  ;;  %v428_v14 = vld [vmem:[#allocation2 + $0x32] sm:$0xff]  ;;  %v526_v19 = vld [vmem:[#allocation2 + $0x41] sm:$0xff] }
  0xa6   : > { %492 = vrot.lane.b32.xlu1 %v475_v44, %s1805_s13  ;;  %v575_v20 = vld [vmem:[#allocation2 + $0x42] sm:$0xff] }
  0xa7   : > { %v325_v60 = vmax.f32 %v315_v59, %v316_v58  ;;  %1657 = vmatprep.subr.bf16.mxu0 %v1656_v13 }
  0xa8   : > { %v2005_v63 = vld [vmem:[#allocation2 + $0x50] sm:$0xff]  ;;  %v286_v1 = vpop.permute.xlu1 %285  ;;  %v284_v2 = vpop.permute.xlu0 %283  ;;  %1659 = vmatpush3.bf16.msra.mxu0 %v1656_v13 }
  0xa9   : > { %590 = vrot.lane.b32.xlu0 %v573_v61, %s1807_s15  ;;  %358 = vst.msk [vmem:[#allocation2 + $0x71] sm:$0xff] %vm327_vm0, %v325_v60  ;;  %v318_v3 = vmax.f32 %v1969_v15, %v286_v1  ;;  %v317_v4 = vmax.f32 %v1972_v16, %v284_v2  ;;  %373 = vst.msk [vmem:[#allocation4 + $0x28] sm:$0xff] %vm327_vm0, %v2005_v63  ;;  %v779_v15 = vld [vmem:[%s2441_s1 + $0x10] sm:$0xff]  ;;  %v780_v16 = vld [vmem:[%s2441_s1 + $0x18] sm:$0xff] }
  0xaa   : > { %541 = vrot.lane.b32.xlu1 %v524_v62, %s1806_s14  ;;  %v1660_v17 = vpack.c.bf16 %v780_v16, %v779_v15  ;;  %v723_v21 = vld [vmem:[#allocation2 + $0x52] sm:$0xff] }
  0xab   : > { %v326_v6 = vmax.f32 %v317_v4, %v318_v3  ;;  %v674_v22 = vld [vmem:[#allocation2 + $0x51] sm:$0xff] }
  0xac   : > { %v479_v7 = vld [vmem:[#allocation2 + $0x60] sm:$0xff]  ;;  %v393_v8 = vpop.permute.xlu0 %392  ;;  %1661 = vmatprep.subr.bf16.mxu0 %v1660_v17 }
  0xad   : > { %398 = vrot.lane.b32.xlu0 %v379_v5, %s1803_s11  ;;  %359 = vst.msk [vmem:[#allocation2 + $0x81] sm:$0xff] %vm327_vm0, %v326_v6  ;;  %374 = vst.msk [vmem:[#allocation4 + $0x30] sm:$0xff] %vm327_vm0, %v479_v7  ;;  %1663 = vmatpush3.bf16.msra.mxu0 %v1660_v17  ;;  %v528_v23 = vld [vmem:[#allocation2 + $0x61] sm:$0xff] }
  0xae   : > { %396 = vrot.lane.b32.xlu1 %v524_v62, %s1803_s11  ;;  %417 = vst.msk [vmem:[#allocation4] sm:$0xff] %vm416_vm3, %v393_v8  ;;  %1623 = vmatprep.subr.msk.mxu0 %vm814_vm5, %v781_v18  ;;  %v577_v24 = vld [vmem:[#allocation2 + $0x62] sm:$0xff] }
  0xb0   : > { %v2019_v9 = vld [vmem:[#allocation2 + $0x70] sm:$0xff]  ;;  %v442_v10 = vpop.permute.xlu0 %441 }
  0xb1   : > { %640 = vrot.lane.b32.xlu0 %v1987_v49, %s1808_s16  ;;  %466 = vst.msk [vmem:[#allocation4] sm:$0xff] %vm465_vm4, %v442_v10  ;;  %1624 = vmatpush3.msk.msra.mxu0 %vm814_vm5, %v781_v18  ;;  %v725_v25 = vld [vmem:[#allocation2 + $0x72] sm:$0xff]  ;;  %vm1216_vm5 = vcmask 392512  }
  0xb2   : > { %638 = vrot.lane.b32.xlu1 %v475_v44, %s1808_s16  ;;  %375 = vst.msk [vmem:[#allocation4 + $0x38] sm:$0xff] %vm327_vm0, %v2019_v9  ;;  %v676_v26 = vld [vmem:[#allocation2 + $0x71] sm:$0xff]  ;;  %vm1020_vm0 = vcmask 130112  }
  0xb4   : > { %v481_v27 = vld [vmem:[#allocation2 + $0x80] sm:$0xff] }
  0xb5   : > { %447 = vrot.lane.b32.xlu0 %v428_v14, %s1804_s12  ;;  %v530_v28 = vld [vmem:[#allocation2 + $0x81] sm:$0xff] }
  0xb6   : > { %445 = vrot.lane.b32.xlu1 %v573_v61, %s1804_s12  ;;  %v579_v29 = vld [vmem:[#allocation2 + $0x82] sm:$0xff] }
  0xb9   : > { %689 = vrot.lane.b32.xlu0 %v379_v5, %s1809_s9 }
  0xba   : > { %687 = vrot.lane.b32.xlu1 %v524_v62, %s1809_s9 }
  0xbd   : > { %496 = vrot.lane.b32.xlu0 %v1996_v55, %s1805_s13 }
  0xbe   : > { %494 = vrot.lane.b32.xlu1 %v1987_v49, %s1805_s13 }
  0xc1   : > { %738 = vrot.lane.b32.xlu0 %v428_v14, %s1810_s23 }
  0xc2   : > { %736 = vrot.lane.b32.xlu1 %v573_v61, %s1810_s23 }
  0xc5   : > { %592 = vrot.lane.b32.xlu0 %v428_v14, %s1807_s15 }
  0xc6   : > { %543 = vrot.lane.b32.xlu1 %v379_v5, %s1806_s14 }
  0xc9   : > { %642 = vrot.lane.b32.xlu0 %v1996_v55, %s1808_s16 }
  0xca   : > { %545 = vrot.lane.b32.xlu1 %v526_v19, %s1806_s14 }
  0xcd   : > { %691 = vrot.lane.b32.xlu0 %v526_v19, %s1809_s9 }
  0xce   : > { %594 = vrot.lane.b32.xlu1 %v575_v20, %s1807_s15 }
  0xd1   : > { %740 = vrot.lane.b32.xlu0 %v575_v20, %s1810_s23 }
  0xd2   : > { %644 = vrot.lane.b32.xlu1 %v2005_v63, %s1808_s16 }
  0xd5   : > { %742 = vrot.lane.b32.xlu0 %v723_v21, %s1810_s23 }
  0xd6   : > { %693 = vrot.lane.b32.xlu1 %v674_v22, %s1809_s9 }
  0xd9   : > { %449 = vrot.lane.b32.xlu0 %v575_v20, %s1804_s12 }
  0xda   : > { %400 = vrot.lane.b32.xlu1 %v526_v19, %s1803_s11 }
  0xdd   : > { %498 = vrot.lane.b32.xlu0 %v2005_v63, %s1805_s13 }
  0xde   : > { %402 = vrot.lane.b32.xlu1 %v674_v22, %s1803_s11 }
  0xe1   : > { %547 = vrot.lane.b32.xlu0 %v674_v22, %s1806_s14 }
  0xe2   : > { %451 = vrot.lane.b32.xlu1 %v723_v21, %s1804_s12 }
  0xe5   : > { %596 = vrot.lane.b32.xlu0 %v723_v21, %s1807_s15 }
  0xe6   : > { %500 = vrot.lane.b32.xlu1 %v479_v7, %s1805_s13 }
  0xe9   : > { %646 = vrot.lane.b32.xlu0 %v479_v7, %s1808_s16 }
  0xea   : > { %549 = vrot.lane.b32.xlu1 %v528_v23, %s1806_s14 }
  0xed   : > { %695 = vrot.lane.b32.xlu0 %v528_v23, %s1809_s9 }
  0xee   : > { %598 = vrot.lane.b32.xlu1 %v577_v24, %s1807_s15 }
  0xf1   : > { %744 = vrot.lane.b32.xlu0 %v577_v24, %s1810_s23 }
  0xf2   : > { %648 = vrot.lane.b32.xlu1 %v2019_v9, %s1808_s16 }
  0xf5   : > { %746 = vrot.lane.b32.xlu0 %v725_v25, %s1810_s23 }
  0xf6   : > { %697 = vrot.lane.b32.xlu1 %v676_v26, %s1809_s9 }
  0xf9   : > { %453 = vrot.lane.b32.xlu0 %v577_v24, %s1804_s12 }
  0xfa   : > { %404 = vrot.lane.b32.xlu1 %v528_v23, %s1803_s11 }
  0xfd   : > { %502 = vrot.lane.b32.xlu0 %v2019_v9, %s1805_s13 }
  0xfe   : > { %406 = vrot.lane.b32.xlu1 %v676_v26, %s1803_s11  ;;  %s1811_s11 = smov 48  }
 0x101   : > { %551 = vrot.lane.b32.xlu0 %v676_v26, %s1806_s14 }
 0x102   : > { %455 = vrot.lane.b32.xlu1 %v725_v25, %s1804_s12 }
 0x105   : > { %600 = vrot.lane.b32.xlu0 %v725_v25, %s1807_s15 }
 0x106   : > { %504 = vrot.lane.b32.xlu1 %v481_v27, %s1805_s13 }
 0x109   : > { %650 = vrot.lane.b32.xlu0 %v481_v27, %s1808_s16 }
 0x10a   : > { %553 = vrot.lane.b32.xlu1 %v530_v28, %s1806_s14 }
 0x10d   : > { %699 = vrot.lane.b32.xlu0 %v530_v28, %s1809_s9 }
 0x10e   : > { %602 = vrot.lane.b32.xlu1 %v579_v29, %s1807_s15  ;;  %s1490_s15 = scalar_lea.sflag [#allocation7], %s215_s7 }
 0x10f   : > { %v491_v32 = vpop.permute.xlu0 %490 }
 0x110   : > { %v395_v31 = vpop.permute.xlu1 %394  ;;  %515 = vst.msk [vmem:[#allocation4] sm:$0xff] %vm514_vm6, %v491_v32 }
 0x111   : > { %418 = vst.msk [vmem:[#allocation4 + $0x8] sm:$0xff] %vm416_vm3, %v395_v31  ;;  %748 = vrot.lane.b32.xlu0 %v579_v29, %s1810_s23 }
 0x112   : > { %652 = vrot.lane.b32.xlu1 %v629_v30, %s1808_s16 }
 0x113   : > { %v540_v35 = vpop.permute.xlu0 %539 }
 0x114   : > { %v444_v34 = vpop.permute.xlu1 %443  ;;  %564 = vst.msk [vmem:[#allocation4] sm:$0xff] %vm563_vm7, %v540_v35 }
 0x115   : > { %467 = vst.msk [vmem:[#allocation4 + $0x8] sm:$0xff] %vm465_vm4, %v444_v34 }
 0x116   : > { %701 = vrot.lane.b32.xlu1 %v678_v33, %s1809_s9  ;;  %s1589_s9 = sshll.u32 %s1870_s22, 7  ;;  %s1818_s22 = smov [#allocation6]  }
 0x117   : > { %v589_v38 = vpop.permute.xlu0 %588  ;;  %s2398_s13 = scalar_lea.hbm %s2445_s5, %s1589_s9 }
 0x118   : > { %v493_v37 = vpop.permute.xlu1 %492  ;;  %613 = vst.msk [vmem:[#allocation4] sm:$0xff] %vm612_vm8, %v589_v38 }
 0x119   : > { %516 = vst.msk [vmem:[#allocation4 + $0x8] sm:$0xff] %vm514_vm6, %v493_v37 }
 0x11a   : > { %750 = vrot.lane.b32.xlu1 %v727_v36, %s1810_s23 }
 0x11b   : > { %v591_v40 = vpop.permute.xlu0 %590 }
 0x11c   : > { %v542_v39 = vpop.permute.xlu1 %541 }
 0x11d   : > { %565 = vst.msk [vmem:[#allocation4 + $0x8] sm:$0xff] %vm563_vm7, %v542_v39 }
 0x11e   : > { %614 = vst.msk [vmem:[#allocation4 + $0x8] sm:$0xff] %vm612_vm8, %v591_v40  ;;  %v980_v40 = vld [vmem:[#allocation3 + $0x1] sm:$0xff] }
 0x11f   : > { %v399_v42 = vpop.permute.xlu0 %398  ;;  %996 = vrot.lane.b32.xlu0 %v980_v40, %s1804_s12 }
 0x120   : > { %v397_v41 = vpop.permute.xlu1 %396  ;;  %420 = vst.msk [vmem:[#allocation4 + $0x18] sm:$0xff] %vm416_vm3, %v399_v42  ;;  %v1233_v42 = vld [vmem:[#allocation3 + $0x90] sm:$0xff] }
 0x121   : > { %419 = vst.msk [vmem:[#allocation4 + $0x10] sm:$0xff] %vm416_vm3, %v397_v41  ;;  %v1029_v41 = vld [vmem:[#allocation3 + $0x2] sm:$0xff]  ;;  %1256 = vrot.lane.b32.xlu1 %v1233_v42, %s1811_s11 }
 0x123   : > { %v641_v44 = vpop.permute.xlu0 %640  ;;  %1045 = vrot.lane.b32.xlu0 %v1029_v41, %s1806_s14 }
 0x124   : > { %v639_v43 = vpop.permute.xlu1 %638  ;;  %664 = vst.msk [vmem:[#allocation4 + $0x8] sm:$0xff] %vm662_vm9, %v641_v44 }
 0x125   : > { %663 = vst.msk [vmem:[#allocation4] sm:$0xff] %vm662_vm9, %v639_v43  ;;  %v964_v43 = vld [vmem:[#allocation3] sm:$0xff] }
 0x126   : > { %972 = vst.msk [vmem:[#allocation5] sm:$0xff] %vm931_vm13, %v964_v43 }
 0x127   : > { %v448_v46 = vpop.permute.xlu0 %447 }
 0x128   : > { %v446_v45 = vpop.permute.xlu1 %445  ;;  %469 = vst.msk [vmem:[#allocation4 + $0x18] sm:$0xff] %vm465_vm4, %v448_v46  ;;  %v2216_v46 = vld [vmem:[%s2442_s2] ss:$0 sm:$0xff] }
 0x129   : > { %468 = vst.msk [vmem:[#allocation4 + $0x10] sm:$0xff] %vm465_vm4, %v446_v45 }
 0x12b   : > { %v690_v48 = vpop.permute.xlu0 %689 }
 0x12c   : > { %v688_v47 = vpop.permute.xlu1 %687  ;;  %713 = vst.msk [vmem:[#allocation4 + $0x8] sm:$0xff] %vm711_vm10, %v690_v48 }
 0x12d   : > { %712 = vst.msk [vmem:[#allocation4] sm:$0xff] %vm711_vm10, %v688_v47 }
 0x12f   : > { %v497_v50 = vpop.permute.xlu0 %496 }
 0x130   : > { %v495_v49 = vpop.permute.xlu1 %494  ;;  %518 = vst.msk [vmem:[#allocation4 + $0x18] sm:$0xff] %vm514_vm6, %v497_v50 }
 0x131   : > { %517 = vst.msk [vmem:[#allocation4 + $0x10] sm:$0xff] %vm514_vm6, %v495_v49 }
 0x133   : > { %v739_v52 = vpop.permute.xlu0 %738 }
 0x134   : > { %v737_v51 = vpop.permute.xlu1 %736  ;;  %762 = vst.msk [vmem:[#allocation4 + $0x8] sm:$0xff] %vm760_vm11, %v739_v52 }
 0x135   : > { %761 = vst.msk [vmem:[#allocation4] sm:$0xff] %vm760_vm11, %v737_v51 }
 0x137   : > { %v593_v54 = vpop.permute.xlu0 %592 }
 0x138   : > { %v544_v53 = vpop.permute.xlu1 %543 }
 0x139   : > { %566 = vst.msk [vmem:[#allocation4 + $0x10] sm:$0xff] %vm563_vm7, %v544_v53 }
 0x13a   : > { %615 = vst.msk [vmem:[#allocation4 + $0x10] sm:$0xff] %vm612_vm8, %v593_v54 }
 0x13b   : > { %v643_v56 = vpop.permute.xlu0 %642  ;;  %v770_v58 = vld [vmem:[#allocation4 + $0x8] sm:$0xff] }
 0x13c   : > { %v546_v55 = vpop.permute.xlu1 %545  ;;  %v769_v57 = vld [vmem:[#allocation4] sm:$0xff]  ;;  %665 = vst.msk [vmem:[#allocation4 + $0x10] sm:$0xff] %vm662_vm9, %v643_v56 }
 0x13d   : > { %567 = vst.msk [vmem:[#allocation4 + $0x18] sm:$0xff] %vm563_vm7, %v546_v55  ;;  %1625 = vmatprep.mubr.msk.f32.mxu0 %vm789_vm12, %v769_v57 }
 0x13e   : > { %1626 = vmatmul.mubr.msk.f32.vlgmr.msra.gmra.mrb[0].mxu0 %vm789_vm12, %v770_v58 }
 0x13f   : > { %v692_v60 = vpop.permute.xlu0 %691 }
 0x140   : > { %v595_v59 = vpop.permute.xlu1 %594  ;;  %714 = vst.msk [vmem:[#allocation4 + $0x10] sm:$0xff] %vm711_vm10, %v692_v60 }
 0x141   : > { %616 = vst.msk [vmem:[#allocation4 + $0x18] sm:$0xff] %vm612_vm8, %v595_v59 }
 0x143   : > { %v741_v62 = vpop.permute.xlu0 %740 }
 0x144   : > { %v645_v61 = vpop.permute.xlu1 %644  ;;  %763 = vst.msk [vmem:[#allocation4 + $0x10] sm:$0xff] %vm760_vm11, %v741_v62 }
 0x145   : > { %666 = vst.msk [vmem:[#allocation4 + $0x18] sm:$0xff] %vm662_vm9, %v645_v61 }
 0x147   : > { %v743_v1 = vpop.permute.xlu0 %742 }
 0x148   : > { %v694_v63 = vpop.permute.xlu1 %693 }
 0x149   : > { %715 = vst.msk [vmem:[#allocation4 + $0x18] sm:$0xff] %vm711_vm10, %v694_v63 }
 0x14a   : > { %764 = vst.msk [vmem:[#allocation4 + $0x18] sm:$0xff] %vm760_vm11, %v743_v1 }
 0x14b   : > { %v450_v3 = vpop.permute.xlu0 %449  ;;  %v771_v4 = vld [vmem:[#allocation4 + $0x10] sm:$0xff] }
 0x14c   : > { %v401_v2 = vpop.permute.xlu1 %400  ;;  %1628 = vmatprep.mubr.msk.f32.mxu0 %vm789_vm12, %v771_v4 }
 0x14d   : > { %421 = vst.msk [vmem:[#allocation4 + $0x20] sm:$0xff] %vm416_vm3, %v401_v2 }
 0x14e   : > { %470 = vst.msk [vmem:[#allocation4 + $0x20] sm:$0xff] %vm465_vm4, %v450_v3 }
 0x14f   : > { %v499_v6 = vpop.permute.xlu0 %498 }
 0x150   : > { %v403_v5 = vpop.permute.xlu1 %402  ;;  %519 = vst.msk [vmem:[#allocation4 + $0x20] sm:$0xff] %vm514_vm6, %v499_v6 }
 0x151   : > { %422 = vst.msk [vmem:[#allocation4 + $0x28] sm:$0xff] %vm416_vm3, %v403_v5  ;;  %v772_v7 = vld [vmem:[#allocation4 + $0x18] sm:$0xff] }
 0x152   : > { %1629 = vmatmul.mubr.msk.f32.gmra.mrb[2].mxu0 %vm789_vm12, %v772_v7  ;;  %v1815_v7 = vmov 0.0|0.0  }
 0x153   : > { %v548_v9 = vpop.permute.xlu0 %547  ;;  %1664 = vmatprep.subr.bf16.mxu1 %v1815_v7 }
 0x154   : > { %v452_v8 = vpop.permute.xlu1 %451  ;;  %568 = vst.msk [vmem:[#allocation4 + $0x20] sm:$0xff] %vm563_vm7, %v548_v9 }
 0x155   : > { %471 = vst.msk [vmem:[#allocation4 + $0x28] sm:$0xff] %vm465_vm4, %v452_v8 }
 0x157   : > { %v597_v11 = vpop.permute.xlu0 %596 }
 0x158   : > { %v501_v10 = vpop.permute.xlu1 %500  ;;  %617 = vst.msk [vmem:[#allocation4 + $0x20] sm:$0xff] %vm612_vm8, %v597_v11 }
 0x159   : > { %520 = vst.msk [vmem:[#allocation4 + $0x28] sm:$0xff] %vm514_vm6, %v501_v10 }
 0x15b   : > { %v647_v13 = vpop.permute.xlu0 %646 }
 0x15c   : > { %v550_v12 = vpop.permute.xlu1 %549  ;;  %667 = vst.msk [vmem:[#allocation4 + $0x20] sm:$0xff] %vm662_vm9, %v647_v13 }
 0x15d   : > { %569 = vst.msk [vmem:[#allocation4 + $0x28] sm:$0xff] %vm563_vm7, %v550_v12 }
 0x15f   : > { %v696_v15 = vpop.permute.xlu0 %695 }
 0x160   : > { %v599_v14 = vpop.permute.xlu1 %598  ;;  %716 = vst.msk [vmem:[#allocation4 + $0x20] sm:$0xff] %vm711_vm10, %v696_v15 }
 0x161   : > { %618 = vst.msk [vmem:[#allocation4 + $0x28] sm:$0xff] %vm612_vm8, %v599_v14 }
 0x163   : > { %v745_v17 = vpop.permute.xlu0 %744 }
 0x164   : > { %v649_v16 = vpop.permute.xlu1 %648  ;;  %765 = vst.msk [vmem:[#allocation4 + $0x20] sm:$0xff] %vm760_vm11, %v745_v17 }
 0x165   : > { %668 = vst.msk [vmem:[#allocation4 + $0x28] sm:$0xff] %vm662_vm9, %v649_v16 }
 0x167   : > { %v747_v19 = vpop.permute.xlu0 %746 }
 0x168   : > { %v698_v18 = vpop.permute.xlu1 %697 }
 0x169   : > { %717 = vst.msk [vmem:[#allocation4 + $0x28] sm:$0xff] %vm711_vm10, %v698_v18 }
 0x16a   : > { %766 = vst.msk [vmem:[#allocation4 + $0x28] sm:$0xff] %vm760_vm11, %v747_v19 }
 0x16b   : > { %v454_v21 = vpop.permute.xlu0 %453  ;;  %v773_v22 = vld [vmem:[#allocation4 + $0x20] sm:$0xff] }
 0x16c   : > { %v405_v20 = vpop.permute.xlu1 %404  ;;  %1631 = vmatprep.mubr.msk.f32.mxu0 %vm789_vm12, %v773_v22 }
 0x16d   : > { %423 = vst.msk [vmem:[#allocation4 + $0x30] sm:$0xff] %vm416_vm3, %v405_v20 }
 0x16e   : > { %472 = vst.msk [vmem:[#allocation4 + $0x30] sm:$0xff] %vm465_vm4, %v454_v21 }
 0x16f   : > { %v503_v24 = vpop.permute.xlu0 %502 }
 0x170   : > { %v407_v23 = vpop.permute.xlu1 %406  ;;  %521 = vst.msk [vmem:[#allocation4 + $0x30] sm:$0xff] %vm514_vm6, %v503_v24 }
 0x171   : > { %424 = vst.msk [vmem:[#allocation4 + $0x38] sm:$0xff] %vm416_vm3, %v407_v23  ;;  %v774_v25 = vld [vmem:[#allocation4 + $0x28] sm:$0xff]  ;;  %vm1118_vm3 = vcmask 261312  }
 0x172   : > { %1632 = vmatmul.mubr.msk.f32.gmra.mrb[4].mxu0 %vm789_vm12, %v774_v25 }
 0x173   : > { %v552_v27 = vpop.permute.xlu0 %551 }
 0x174   : > { %v456_v26 = vpop.permute.xlu1 %455  ;;  %570 = vst.msk [vmem:[#allocation4 + $0x30] sm:$0xff] %vm563_vm7, %v552_v27 }
 0x175   : > { %473 = vst.msk [vmem:[#allocation4 + $0x38] sm:$0xff] %vm465_vm4, %v456_v26  ;;  %vm1167_vm4 = vcmask 326912  }
 0x177   : > { %v601_v29 = vpop.permute.xlu0 %600 }
 0x178   : > { %v505_v28 = vpop.permute.xlu1 %504  ;;  %619 = vst.msk [vmem:[#allocation4 + $0x30] sm:$0xff] %vm612_vm8, %v601_v29 }
 0x179   : > { %522 = vst.msk [vmem:[#allocation4 + $0x38] sm:$0xff] %vm514_vm6, %v505_v28  ;;  %vm1266_vm6 = vcmask 458112  }
 0x17b   : > { %v651_v31 = vpop.permute.xlu0 %650 }
 0x17c   : > { %v554_v30 = vpop.permute.xlu1 %553  ;;  %669 = vst.msk [vmem:[#allocation4 + $0x30] sm:$0xff] %vm662_vm9, %v651_v31 }
 0x17d   : > { %571 = vst.msk [vmem:[#allocation4 + $0x38] sm:$0xff] %vm563_vm7, %v554_v30  ;;  %vm1315_vm7 = vcmask 523712  }
 0x17f   : > { %v700_v33 = vpop.permute.xlu0 %699 }
 0x180   : > { %v603_v32 = vpop.permute.xlu1 %602  ;;  %718 = vst.msk [vmem:[#allocation4 + $0x30] sm:$0xff] %vm711_vm10, %v700_v33 }
 0x181   : > { %620 = vst.msk [vmem:[#allocation4 + $0x38] sm:$0xff] %vm612_vm8, %v603_v32  ;;  %vm1364_vm8 = vcmask 589312  }
 0x183   : > { %v749_v35 = vpop.permute.xlu0 %748 }
 0x184   : > { %v653_v34 = vpop.permute.xlu1 %652  ;;  %767 = vst.msk [vmem:[#allocation4 + $0x30] sm:$0xff] %vm760_vm11, %v749_v35 }
 0x185   : > { %670 = vst.msk [vmem:[#allocation4 + $0x38] sm:$0xff] %vm662_vm9, %v653_v34  ;;  %vm1388_vm9 = vcmask 588800  }
 0x188   : > { %v702_v36 = vpop.permute.xlu1 %701 }
 0x189   : > { %719 = vst.msk [vmem:[#allocation4 + $0x38] sm:$0xff] %vm711_vm10, %v702_v36  ;;  %v1282_v36 = vld [vmem:[#allocation3 + $0x91] sm:$0xff]  ;;  %vm2329_vm10 = vmpackc.low %vm1388_vm9, %vm1388_vm9 }
 0x18b   : > { %v775_v38 = vld [vmem:[#allocation4 + $0x30] sm:$0xff] }
 0x18c   : > { %v751_v37 = vpop.permute.xlu1 %750  ;;  %1634 = vmatprep.mubr.msk.f32.mxu0 %vm789_vm12, %v775_v38 }
 0x18d   : > { %768 = vst.msk [vmem:[#allocation4 + $0x38] sm:$0xff] %vm760_vm11, %v751_v37  ;;  %vm1487_vm11 = vcmask 523264  }
 0x191   : > { %v997_v44 = vpop.permute.xlu0 %996 }
 0x192   : > { %1021 = vst.msk [vmem:[#allocation5] sm:$0xff] %vm1020_vm0, %v997_v44  ;;  %v1382_v44 = vld [vmem:[%s2444_s4] sm:$0xff] }
 0x193   : > { %v2297_v33 = vpop.permute.xlu1 %1256 }
 0x194   : > { %v776_v39 = vld [vmem:[#allocation4 + $0x38] sm:$0xff] }
 0x195   : > { %1635 = vmatmul.mubr.msk.f32.gmra.mrb[6].mxu0 %vm789_vm12, %v776_v39  ;;  %v1046_v45 = vpop.permute.xlu0 %1045  ;;  %v1331_v39 = vld [vmem:[#allocation3 + $0x92] sm:$0xff] }
 0x196   : > { %1070 = vst.msk [vmem:[#allocation5] sm:$0xff] %vm1069_vm1, %v1046_v45  ;;  %v1817_v45 = vmov 0  }
 0x197   : > { %1736 = vset.pattern.permute.xlu0 %v1817_v45 }
 0x211   : > { %v1627_v47 = vpop.f32.mrb[0].mxu0 }
 0x212   : > { %v890_v48 = vadd.f32 %v1627_v47, %v2216_v46  ;;  %v884_v49 = vpop.f32.mrb[1].mxu0 }
 0x213   : > { %v885_v50 = vadd.f32 %v2216_v46, %v884_v49 }
 0x214   : > { %v924_v51 = vmax.f32 %v890_v48, 0.0 }
 0x215   : > { %v923_v52 = vmax.f32 %v885_v50, 0.0 }
 0x216   : > { %957 = vst.msk [vmem:[#allocation3 + $0x21] sm:$0xff] %vm931_vm13, %v924_v51 }
 0x217   : > { %956 = vst.msk [vmem:[#allocation3 + $0x11] sm:$0xff] %vm931_vm13, %v923_v52 }
 0x21d   : > { %v1226_v53 = vld [vmem:[#allocation3 + $0x20] sm:$0xff] }
 0x21e   : > { %1242 = vrot.lane.b32.xlu0 %v1226_v53, %s1811_s11  ;;  %1096 = vrot.lane.b32.xlu1 %v1226_v53, %s1808_s16  ;;  %v1078_v54 = vld [vmem:[#allocation3 + $0x10] sm:$0xff]  ;;  %974 = vst.msk [vmem:[#allocation5 + $0x10] sm:$0xff] %vm931_vm13, %v1226_v53  ;;  %v1275_v55 = vld [vmem:[#allocation3 + $0x21] sm:$0xff] }
 0x21f   : > { %973 = vst.msk [vmem:[#allocation5 + $0x8] sm:$0xff] %vm931_vm13, %v1078_v54  ;;  %v1324_v57 = vld [vmem:[#allocation3 + $0x22] sm:$0xff]  ;;  %v981_v63 = vld [vmem:[#allocation3 + $0x11] sm:$0xff] }
 0x220   : > { %v1030_v1 = vld [vmem:[#allocation3 + $0x12] sm:$0xff] }
 0x222   : > { %1291 = vrot.lane.b32.xlu0 %v1275_v55, %s1812_s25  ;;  %1145 = vrot.lane.b32.xlu1 %v1275_v55, %s1810_s23 }
 0x225   : > { %v1630_v56 = vpop.f32.mrb[2].mxu0 }
 0x226   : > { %v900_v58 = vadd.f32 %v1630_v56, %v2216_v46  ;;  %1340 = vrot.lane.b32.xlu0 %v1324_v57, %s1813_s26  ;;  %1194 = vrot.lane.b32.xlu1 %v1324_v57, %s1814_s30  ;;  %v894_v59 = vpop.f32.mrb[3].mxu0 }
 0x227   : > { %v895_v60 = vadd.f32 %v2216_v46, %v894_v59 }
 0x228   : > { %v926_v61 = vmax.f32 %v900_v58, 0.0 }
 0x229   : > { %v925_v62 = vmax.f32 %v895_v60, 0.0 }
 0x22a   : > { %959 = vst.msk [vmem:[#allocation3 + $0x41] sm:$0xff] %vm931_vm13, %v926_v61  ;;  %1000 = vrot.lane.b32.xlu0 %v1275_v55, %s1804_s12  ;;  %998 = vrot.lane.b32.xlu1 %v981_v63, %s1804_s12 }
 0x22b   : > { %958 = vst.msk [vmem:[#allocation3 + $0x31] sm:$0xff] %vm931_vm13, %v925_v62 }
 0x22e   : > { %1049 = vrot.lane.b32.xlu0 %v1324_v57, %s1806_s14  ;;  %1047 = vrot.lane.b32.xlu1 %v1030_v1, %s1806_s14 }
 0x231   : > { %v1081_v2 = vld [vmem:[#allocation3 + $0x40] sm:$0xff] }
 0x232   : > { %1094 = vrot.lane.b32.xlu0 %v1078_v54, %s1808_s16  ;;  %1100 = vrot.lane.b32.xlu1 %v1081_v2, %s1808_s16  ;;  %v1227_v3 = vld [vmem:[#allocation3 + $0x30] sm:$0xff]  ;;  %976 = vst.msk [vmem:[#allocation5 + $0x20] sm:$0xff] %vm931_vm13, %v1081_v2  ;;  %v1130_v4 = vld [vmem:[#allocation3 + $0x41] sm:$0xff] }
 0x233   : > { %975 = vst.msk [vmem:[#allocation5 + $0x18] sm:$0xff] %vm931_vm13, %v1227_v3  ;;  %v1179_v5 = vld [vmem:[#allocation3 + $0x42] sm:$0xff]  ;;  %v1276_v6 = vld [vmem:[#allocation3 + $0x31] sm:$0xff] }
 0x234   : > { %v1325_v9 = vld [vmem:[#allocation3 + $0x32] sm:$0xff] }
 0x236   : > { %1143 = vrot.lane.b32.xlu0 %v981_v63, %s1810_s23  ;;  %1149 = vrot.lane.b32.xlu1 %v1130_v4, %s1810_s23 }
 0x23a   : > { %1192 = vrot.lane.b32.xlu0 %v1030_v1, %s1814_s30  ;;  %1198 = vrot.lane.b32.xlu1 %v1179_v5, %s1814_s30 }
 0x23e   : > { %1246 = vrot.lane.b32.xlu0 %v1081_v2, %s1811_s11  ;;  %1244 = vrot.lane.b32.xlu1 %v1227_v3, %s1811_s11 }
 0x242   : > { %1295 = vrot.lane.b32.xlu0 %v1130_v4, %s1812_s25  ;;  %1293 = vrot.lane.b32.xlu1 %v1276_v6, %s1812_s25 }
 0x245   : > { %v1633_v8 = vpop.f32.mrb[4].mxu0 }
 0x246   : > { %v910_v10 = vadd.f32 %v1633_v8, %v2216_v46  ;;  %1344 = vrot.lane.b32.xlu0 %v1179_v5, %s1813_s26  ;;  %1342 = vrot.lane.b32.xlu1 %v1325_v9, %s1813_s26  ;;  %v904_v11 = vpop.f32.mrb[5].mxu0 }
 0x247   : > { %v905_v12 = vadd.f32 %v2216_v46, %v904_v11 }
 0x248   : > { %v928_v13 = vmax.f32 %v910_v10, 0.0 }
 0x249   : > { %v927_v14 = vmax.f32 %v905_v12, 0.0 }
 0x24a   : > { %961 = vst.msk [vmem:[#allocation3 + $0x61] sm:$0xff] %vm931_vm13, %v928_v13  ;;  %1004 = vrot.lane.b32.xlu0 %v1130_v4, %s1804_s12  ;;  %1002 = vrot.lane.b32.xlu1 %v1276_v6, %s1804_s12 }
 0x24b   : > { %960 = vst.msk [vmem:[#allocation3 + $0x51] sm:$0xff] %vm931_vm13, %v927_v14 }
 0x24e   : > { %1053 = vrot.lane.b32.xlu0 %v1179_v5, %s1806_s14  ;;  %1051 = vrot.lane.b32.xlu1 %v1325_v9, %s1806_s14 }
 0x251   : > { %v1083_v15 = vld [vmem:[#allocation3 + $0x60] sm:$0xff] }
 0x252   : > { %1098 = vrot.lane.b32.xlu0 %v1227_v3, %s1808_s16  ;;  %1104 = vrot.lane.b32.xlu1 %v1083_v15, %s1808_s16  ;;  %v1229_v16 = vld [vmem:[#allocation3 + $0x50] sm:$0xff]  ;;  %978 = vst.msk [vmem:[#allocation5 + $0x30] sm:$0xff] %vm931_vm13, %v1083_v15  ;;  %v1132_v17 = vld [vmem:[#allocation3 + $0x61] sm:$0xff] }
 0x253   : > { %977 = vst.msk [vmem:[#allocation5 + $0x28] sm:$0xff] %vm931_vm13, %v1229_v16  ;;  %v1181_v18 = vld [vmem:[#allocation3 + $0x62] sm:$0xff]  ;;  %v1278_v19 = vld [vmem:[#allocation3 + $0x51] sm:$0xff] }
 0x254   : > { %v1327_v20 = vld [vmem:[#allocation3 + $0x52] sm:$0xff] }
 0x256   : > { %1147 = vrot.lane.b32.xlu0 %v1276_v6, %s1810_s23  ;;  %1153 = vrot.lane.b32.xlu1 %v1132_v17, %s1810_s23 }
 0x25a   : > { %1196 = vrot.lane.b32.xlu0 %v1325_v9, %s1814_s30  ;;  %1202 = vrot.lane.b32.xlu1 %v1181_v18, %s1814_s30 }
 0x25e   : > { %1250 = vrot.lane.b32.xlu0 %v1083_v15, %s1811_s11  ;;  %1248 = vrot.lane.b32.xlu1 %v1229_v16, %s1811_s11 }
 0x262   : > { %1299 = vrot.lane.b32.xlu0 %v1132_v17, %s1812_s25  ;;  %1297 = vrot.lane.b32.xlu1 %v1278_v19, %s1812_s25 }
 0x266   : > { %1348 = vrot.lane.b32.xlu0 %v1181_v18, %s1813_s26  ;;  %1346 = vrot.lane.b32.xlu1 %v1327_v20, %s1813_s26 }
 0x268   : > { %v1636_v21 = vpop.f32.mrb[6].mxu0 }
 0x269   : > { %v920_v22 = vadd.f32 %v1636_v21, %v2216_v46  ;;  %v914_v23 = vpop.f32.mrb[7].mxu0 }
 0x26a   : > { %v915_v24 = vadd.f32 %v2216_v46, %v914_v23  ;;  %1008 = vrot.lane.b32.xlu0 %v1132_v17, %s1804_s12  ;;  %1006 = vrot.lane.b32.xlu1 %v1278_v19, %s1804_s12 }
 0x26b   : > { %v930_v25 = vmax.f32 %v920_v22, 0.0 }
 0x26c   : > { %v929_v26 = vmax.f32 %v915_v24, 0.0 }
 0x26d   : > { %963 = vst.msk [vmem:[#allocation3 + $0x81] sm:$0xff] %vm931_vm13, %v930_v25 }
 0x26e   : > { %962 = vst.msk [vmem:[#allocation3 + $0x71] sm:$0xff] %vm931_vm13, %v929_v26  ;;  %1057 = vrot.lane.b32.xlu0 %v1181_v18, %s1806_s14  ;;  %1055 = vrot.lane.b32.xlu1 %v1327_v20, %s1806_s14 }
 0x272   : > { %1102 = vrot.lane.b32.xlu0 %v1229_v16, %s1808_s16 }
 0x274   : > { %v1085_v27 = vld [vmem:[#allocation3 + $0x80] sm:$0xff] }
 0x275   : > { %1108 = vrot.lane.b32.xlu1 %v1085_v27, %s1808_s16  ;;  %v1231_v28 = vld [vmem:[#allocation3 + $0x70] sm:$0xff]  ;;  %v1134_v29 = vld [vmem:[#allocation3 + $0x81] sm:$0xff] }
 0x276   : > { %1151 = vrot.lane.b32.xlu0 %v1278_v19, %s1810_s23  ;;  %979 = vst.msk [vmem:[#allocation5 + $0x38] sm:$0xff] %vm931_vm13, %v1231_v28  ;;  %v1183_v30 = vld [vmem:[#allocation3 + $0x82] sm:$0xff]  ;;  %v1280_v31 = vld [vmem:[#allocation3 + $0x71] sm:$0xff] }
 0x277   : > { %v1329_v32 = vld [vmem:[#allocation3 + $0x72] sm:$0xff] }
 0x279   : > { %1157 = vrot.lane.b32.xlu1 %v1134_v29, %s1810_s23 }
 0x27a   : > { %1200 = vrot.lane.b32.xlu0 %v1327_v20, %s1814_s30 }
 0x27d   : > { %1206 = vrot.lane.b32.xlu1 %v1183_v30, %s1814_s30 }
 0x27e   : > { %1254 = vrot.lane.b32.xlu0 %v1085_v27, %s1811_s11 }
 0x281   : > { %1252 = vrot.lane.b32.xlu1 %v1231_v28, %s1811_s11 }
 0x282   : > { %1303 = vrot.lane.b32.xlu0 %v1134_v29, %s1812_s25 }
 0x285   : > { %1301 = vrot.lane.b32.xlu1 %v1280_v31, %s1812_s25 }
 0x286   : > { %1106 = vrot.lane.b32.xlu0 %v1231_v28, %s1808_s16 }
 0x289   : > { %1350 = vrot.lane.b32.xlu1 %v1329_v32, %s1813_s26 }
 0x28a   : > { %1155 = vrot.lane.b32.xlu0 %v1280_v31, %s1810_s23 }
 0x28d   : > { %1010 = vrot.lane.b32.xlu1 %v1280_v31, %s1804_s12 }
 0x28e   : > { %1204 = vrot.lane.b32.xlu0 %v1329_v32, %s1814_s30 }
 0x290   : > { %v1097_v34 = vpop.permute.xlu1 %1096  ;;  %v1243_v35 = vpop.permute.xlu0 %1242 }
 0x291   : > { %1059 = vrot.lane.b32.xlu1 %v1329_v32, %s1806_s14 }
 0x292   : > { %1352 = vrot.lane.b32.xlu0 %v1183_v30, %s1813_s26 }
 0x294   : > { %v1146_v37 = vpop.permute.xlu1 %1145  ;;  %v1292_v38 = vpop.permute.xlu0 %1291 }
 0x295   : > { %1305 = vrot.lane.b32.xlu1 %v1282_v36, %s1812_s25  ;;  %s1737_s25 = scalar_lea.vmem %s2400_s17, 128 }
 0x296   : > { %1385 = vperm.xlu0 %1736, %v1382_v44   ;;  %p1738_p11 = scmp.ne.s32.totalorder %s2400_s17, %s1737_s25 }
 0x298   : > { %v1195_v40 = vpop.permute.xlu1 %1194  ;;  %v1341_v41 = vpop.permute.xlu0 %1340  ;;  %p1739_p12 = pnand %p1738_p11, %p1887_p5 }
 0x299   : > { %1354 = vrot.lane.b32.xlu1 %v1331_v39, %s1813_s26  ;;  %s1741_s26 = sshll.u32 %s1818_s22, 4  ;;  %s1742_s26 = int_to_ptr.vmem [resolvable:$false] %s1741_s26 }
 0x29a   : > { %p1740_p13 = pneg %p1739_p12  ;;  %s1743_s30 = scalar_lea.vmem %s1742_s26, 256 }
 0x29b   : > { %p1744_p0 = scmp.lt.s32.totalorder %s2400_s17, %s1742_s26  ;;  %p1745_p1 = scmp.lt.s32.totalorder %s1743_s30, %s1737_s25 }
 0x29c   : > { %v999_v42 = vpop.permute.xlu1 %998  ;;  %v1001_v43 = vpop.permute.xlu0 %1000 }
 0x29d   : > { %1022 = vst.msk [vmem:[#allocation5 + $0x8] sm:$0xff] %vm1020_vm0, %v999_v42  ;;  %1023 = vst.msk [vmem:[#allocation5 + $0x10] sm:$0xff] %vm1020_vm0, %v1001_v43  ;;  %p1746_p2 = por %p1745_p1, %p1744_p0 }
 0x29f   : > { %p1747_p3 = pnand %p1746_p2, %p1740_p13 }
 0x2a0   : > { %v1048_v46 = vpop.permute.xlu1 %1047  ;;  %v1050_v0 = vpop.permute.xlu0 %1049 }
 0x2a1   : > { %1071 = vst.msk [vmem:[#allocation5 + $0x8] sm:$0xff] %vm1069_vm1, %v1048_v46  ;;  %1072 = vst.msk [vmem:[#allocation5 + $0x10] sm:$0xff] %vm1069_vm1, %v1050_v0 }
 0x2a2   : > { %1120 = vst.msk [vmem:[#allocation5 + $0x8] sm:$0xff] %vm1118_vm3, %v1097_v34 }
 0x2a3   : > { %1169 = vst.msk [vmem:[#allocation5 + $0x8] sm:$0xff] %vm1167_vm4, %v1146_v37 }
 0x2a4   : > { %v1101_v47 = vpop.permute.xlu1 %1100  ;;  %v1095_v48 = vpop.permute.xlu0 %1094  ;;  %1218 = vst.msk [vmem:[#allocation5 + $0x8] sm:$0xff] %vm1216_vm5, %v1195_v40 }
 0x2a5   : > { %1119 = vst.msk [vmem:[#allocation5] sm:$0xff] %vm1118_vm3, %v1095_v48 }
 0x2a8   : > { %v1150_v49 = vpop.permute.xlu1 %1149  ;;  %v1144_v50 = vpop.permute.xlu0 %1143 }
 0x2a9   : > { %1168 = vst.msk [vmem:[#allocation5] sm:$0xff] %vm1167_vm4, %v1144_v50 }
 0x2ac   : > { %v1199_v51 = vpop.permute.xlu1 %1198  ;;  %v1193_v52 = vpop.permute.xlu0 %1192 }
 0x2ad   : > { %1217 = vst.msk [vmem:[#allocation5] sm:$0xff] %vm1216_vm5, %v1193_v52 }
 0x2ae   : > { %1267 = vst.msk [vmem:[#allocation5] sm:$0xff] %vm1266_vm6, %v1243_v35 }
 0x2af   : > { %1316 = vst.msk [vmem:[#allocation5] sm:$0xff] %vm1315_vm7, %v1292_v38 }
 0x2b0   : > { %1365 = vst.msk [vmem:[#allocation5] sm:$0xff] %vm1364_vm8, %v1341_v41  ;;  %v1245_v53 = vpop.permute.xlu1 %1244  ;;  %v1247_v54 = vpop.permute.xlu0 %1246 }
 0x2b1   : > { %1268 = vst.msk [vmem:[#allocation5 + $0x8] sm:$0xff] %vm1266_vm6, %v1245_v53 }
 0x2b4   : > { %v1294_v55 = vpop.permute.xlu1 %1293  ;;  %v1296_v56 = vpop.permute.xlu0 %1295 }
 0x2b5   : > { %1317 = vst.msk [vmem:[#allocation5 + $0x8] sm:$0xff] %vm1315_vm7, %v1294_v55 }
 0x2b7   : > { %v1374_v63 = vld [vmem:[#allocation5] sm:$0xff] }
 0x2b8   : > { %v1343_v57 = vpop.permute.xlu1 %1342  ;;  %v1345_v58 = vpop.permute.xlu0 %1344 }
 0x2b9   : > { %1366 = vst.msk [vmem:[#allocation5 + $0x8] sm:$0xff] %vm1364_vm8, %v1343_v57 }
 0x2bc   : > { %v1003_v59 = vpop.permute.xlu1 %1002  ;;  %v1005_v60 = vpop.permute.xlu0 %1004 }
 0x2bd   : > { %1024 = vst.msk [vmem:[#allocation5 + $0x18] sm:$0xff] %vm1020_vm0, %v1003_v59  ;;  %1025 = vst.msk [vmem:[#allocation5 + $0x20] sm:$0xff] %vm1020_vm0, %v1005_v60 }
 0x2c0   : > { %v1052_v61 = vpop.permute.xlu1 %1051  ;;  %v1054_v62 = vpop.permute.xlu0 %1053  ;;  %v1375_v1 = vld [vmem:[#allocation5 + $0x8] sm:$0xff] }
 0x2c1   : > { %1073 = vst.msk [vmem:[#allocation5 + $0x18] sm:$0xff] %vm1069_vm1, %v1052_v61  ;;  %1074 = vst.msk [vmem:[#allocation5 + $0x20] sm:$0xff] %vm1069_vm1, %v1054_v62  ;;  %v1665_v3 = vpack.c.bf16 %v1375_v1, %v1374_v63 }
 0x2c2   : > { %1122 = vst.msk [vmem:[#allocation5 + $0x18] sm:$0xff] %vm1118_vm3, %v1101_v47 }
 0x2c3   : > { %1171 = vst.msk [vmem:[#allocation5 + $0x18] sm:$0xff] %vm1167_vm4, %v1150_v49  ;;  %1667 = vmatpush3.bf16.xpose.msk.msra.mxu1 %vm2329_vm10, %v1665_v3  ;;  %v1373_v49 = vld [vmem:[%s2443_s3] sm:$0xff] }
 0x2c4   : > { %1220 = vst.msk [vmem:[#allocation5 + $0x18] sm:$0xff] %vm1216_vm5, %v1199_v51  ;;  %v1105_v4 = vpop.permute.xlu1 %1104  ;;  %v1099_v5 = vpop.permute.xlu0 %1098  ;;  %1668 = vmatprep.subr.bf16.mxu1 %v1815_v7 }
 0x2c5   : > { %1121 = vst.msk [vmem:[#allocation5 + $0x10] sm:$0xff] %vm1118_vm3, %v1099_v5 }
 0x2c8   : > { %v1154_v6 = vpop.permute.xlu1 %1153  ;;  %v1148_v8 = vpop.permute.xlu0 %1147 }
 0x2c9   : > { %1170 = vst.msk [vmem:[#allocation5 + $0x10] sm:$0xff] %vm1167_vm4, %v1148_v8 }
 0x2cc   : > { %v1203_v9 = vpop.permute.xlu1 %1202  ;;  %v1197_v10 = vpop.permute.xlu0 %1196 }
 0x2cd   : > { %1219 = vst.msk [vmem:[#allocation5 + $0x10] sm:$0xff] %vm1216_vm5, %v1197_v10 }
 0x2ce   : > { %1269 = vst.msk [vmem:[#allocation5 + $0x10] sm:$0xff] %vm1266_vm6, %v1247_v54 }
 0x2cf   : > { %1318 = vst.msk [vmem:[#allocation5 + $0x10] sm:$0xff] %vm1315_vm7, %v1296_v56 }
 0x2d0   : > { %1367 = vst.msk [vmem:[#allocation5 + $0x10] sm:$0xff] %vm1364_vm8, %v1345_v58  ;;  %v1249_v11 = vpop.permute.xlu1 %1248  ;;  %v1251_v12 = vpop.permute.xlu0 %1250 }
 0x2d1   : > { %1270 = vst.msk [vmem:[#allocation5 + $0x18] sm:$0xff] %vm1266_vm6, %v1249_v11 }
 0x2d4   : > { %v1298_v13 = vpop.permute.xlu1 %1297  ;;  %v1300_v14 = vpop.permute.xlu0 %1299 }
 0x2d5   : > { %1319 = vst.msk [vmem:[#allocation5 + $0x18] sm:$0xff] %vm1315_vm7, %v1298_v13 }
 0x2d7   : > { %v1376_v21 = vld [vmem:[#allocation5 + $0x10] sm:$0xff] }
 0x2d8   : > { %v1347_v15 = vpop.permute.xlu1 %1346  ;;  %v1349_v16 = vpop.permute.xlu0 %1348 }
 0x2d9   : > { %1368 = vst.msk [vmem:[#allocation5 + $0x18] sm:$0xff] %vm1364_vm8, %v1347_v15 }
 0x2dc   : > { %v1007_v17 = vpop.permute.xlu1 %1006  ;;  %v1009_v18 = vpop.permute.xlu0 %1008 }
 0x2dd   : > { %1026 = vst.msk [vmem:[#allocation5 + $0x28] sm:$0xff] %vm1020_vm0, %v1007_v17  ;;  %1027 = vst.msk [vmem:[#allocation5 + $0x30] sm:$0xff] %vm1020_vm0, %v1009_v18 }
 0x2e0   : > { %v1056_v19 = vpop.permute.xlu1 %1055  ;;  %v1058_v20 = vpop.permute.xlu0 %1057  ;;  %v1377_v22 = vld [vmem:[#allocation5 + $0x18] sm:$0xff] }
 0x2e1   : > { %1075 = vst.msk [vmem:[#allocation5 + $0x28] sm:$0xff] %vm1069_vm1, %v1056_v19  ;;  %1076 = vst.msk [vmem:[#allocation5 + $0x30] sm:$0xff] %vm1069_vm1, %v1058_v20  ;;  %v1669_v23 = vpack.c.bf16 %v1377_v22, %v1376_v21 }
 0x2e2   : > { %1124 = vst.msk [vmem:[#allocation5 + $0x28] sm:$0xff] %vm1118_vm3, %v1105_v4 }
 0x2e3   : > { %1173 = vst.msk [vmem:[#allocation5 + $0x28] sm:$0xff] %vm1167_vm4, %v1154_v6  ;;  %1671 = vmatpush3.bf16.xpose.msk.msra.mxu1 %vm2329_vm10, %v1669_v23 }
 0x2e4   : > { %1222 = vst.msk [vmem:[#allocation5 + $0x28] sm:$0xff] %vm1216_vm5, %v1203_v9  ;;  %v1103_v24 = vpop.permute.xlu0 %1102  ;;  %1672 = vmatprep.subr.bf16.mxu1 %v1815_v7 }
 0x2e5   : > { %1123 = vst.msk [vmem:[#allocation5 + $0x20] sm:$0xff] %vm1118_vm3, %v1103_v24 }
 0x2e7   : > { %v1109_v25 = vpop.permute.xlu1 %1108 }
 0x2e8   : > { %v1152_v26 = vpop.permute.xlu0 %1151 }
 0x2e9   : > { %1172 = vst.msk [vmem:[#allocation5 + $0x20] sm:$0xff] %vm1167_vm4, %v1152_v26 }
 0x2eb   : > { %v1158_v27 = vpop.permute.xlu1 %1157 }
 0x2ec   : > { %v1201_v28 = vpop.permute.xlu0 %1200 }
 0x2ed   : > { %1221 = vst.msk [vmem:[#allocation5 + $0x20] sm:$0xff] %vm1216_vm5, %v1201_v28 }
 0x2ee   : > { %1271 = vst.msk [vmem:[#allocation5 + $0x20] sm:$0xff] %vm1266_vm6, %v1251_v12 }
 0x2ef   : > { %1320 = vst.msk [vmem:[#allocation5 + $0x20] sm:$0xff] %vm1315_vm7, %v1300_v14  ;;  %v1207_v29 = vpop.permute.xlu1 %1206 }
 0x2f0   : > { %1369 = vst.msk [vmem:[#allocation5 + $0x20] sm:$0xff] %vm1364_vm8, %v1349_v16  ;;  %v1255_v30 = vpop.permute.xlu0 %1254 }
 0x2f3   : > { %v1253_v31 = vpop.permute.xlu1 %1252 }
 0x2f4   : > { %1272 = vst.msk [vmem:[#allocation5 + $0x28] sm:$0xff] %vm1266_vm6, %v1253_v31  ;;  %v1304_v32 = vpop.permute.xlu0 %1303 }
 0x2f7   : > { %v1302_v34 = vpop.permute.xlu1 %1301  ;;  %v1378_v41 = vld [vmem:[#allocation5 + $0x20] sm:$0xff] }
 0x2f8   : > { %1321 = vst.msk [vmem:[#allocation5 + $0x28] sm:$0xff] %vm1315_vm7, %v1302_v34  ;;  %v1107_v35 = vpop.permute.xlu0 %1106 }
 0x2f9   : > { %1125 = vst.msk [vmem:[#allocation5 + $0x30] sm:$0xff] %vm1118_vm3, %v1107_v35 }
 0x2fb   : > { %v1351_v36 = vpop.permute.xlu1 %1350 }
 0x2fc   : > { %1370 = vst.msk [vmem:[#allocation5 + $0x28] sm:$0xff] %vm1364_vm8, %v1351_v36  ;;  %v1156_v37 = vpop.permute.xlu0 %1155 }
 0x2fd   : > { %1174 = vst.msk [vmem:[#allocation5 + $0x30] sm:$0xff] %vm1167_vm4, %v1156_v37 }
 0x2ff   : > { %v1011_v38 = vpop.permute.xlu1 %1010 }
 0x300   : > { %1028 = vst.msk [vmem:[#allocation5 + $0x38] sm:$0xff] %vm1020_vm0, %v1011_v38  ;;  %v1205_v39 = vpop.permute.xlu0 %1204 }
 0x301   : > { %1223 = vst.msk [vmem:[#allocation5 + $0x30] sm:$0xff] %vm1216_vm5, %v1205_v39 }
 0x302   : > { %1273 = vst.msk [vmem:[#allocation5 + $0x30] sm:$0xff] %vm1266_vm6, %v1255_v30 }
 0x303   : > { %1322 = vst.msk [vmem:[#allocation5 + $0x30] sm:$0xff] %vm1315_vm7, %v1304_v32  ;;  %v1060_v40 = vpop.permute.xlu1 %1059  ;;  %v1379_v42 = vld [vmem:[#allocation5 + $0x28] sm:$0xff] }
 0x304   : > { %1077 = vst.msk [vmem:[#allocation5 + $0x38] sm:$0xff] %vm1069_vm1, %v1060_v40  ;;  %v1353_v43 = vpop.permute.xlu0 %1352  ;;  %v1673_v44 = vpack.c.bf16 %v1379_v42, %v1378_v41 }
 0x305   : > { %1126 = vst.msk [vmem:[#allocation5 + $0x38] sm:$0xff] %vm1118_vm3, %v1109_v25 }
 0x306   : > { %1371 = vst.msk [vmem:[#allocation5 + $0x30] sm:$0xff] %vm1364_vm8, %v1353_v43  ;;  %1675 = vmatpush3.bf16.xpose.msk.msra.mxu1 %vm2329_vm10, %v1673_v44 }
 0x307   : > { %1175 = vst.msk [vmem:[#allocation5 + $0x38] sm:$0xff] %vm1167_vm4, %v1158_v27  ;;  %v1306_v45 = vpop.permute.xlu1 %1305  ;;  %1676 = vmatprep.subr.bf16.mxu1 %v1815_v7 }
 0x308   : > { %1224 = vst.msk [vmem:[#allocation5 + $0x38] sm:$0xff] %vm1216_vm5, %v1207_v29 }
 0x309   : > { %1274 = vst.msk [vmem:[#allocation5 + $0x38] sm:$0xff] %vm1266_vm6, %v2297_v33 }
 0x30a   : > { %1323 = vst.msk [vmem:[#allocation5 + $0x38] sm:$0xff] %vm1315_vm7, %v1306_v45 }
 0x30b   : > { %v1355_v46 = vpop.permute.xlu1 %1354 }
 0x30c   : > { %1372 = vst.msk [vmem:[#allocation5 + $0x38] sm:$0xff] %vm1364_vm8, %v1355_v46 }
 0x30d   : > { %v1380_v0 = vld [vmem:[#allocation5 + $0x30] sm:$0xff] }
 0x313   : > { %v1381_v47 = vld [vmem:[#allocation5 + $0x38] sm:$0xff] }
 0x314   : > { %v1677_v48 = vpack.c.bf16 %v1381_v47, %v1380_v0 }
 0x315   : > { %v1386_v7 = vpop.permute.xlu0 %1385 }
 0x316   : > { %1679 = vmatpush3.bf16.xpose.msk.msra.mxu1 %vm2329_vm10, %v1677_v48 }
 0x31d   : > { %1654 = vmatmul.mubr.msk.f32.vlgmr.msra.gmra.mrb[0].mxu1 %vm1388_vm9, %v1373_v49 }
 0x3f0   : > { %v1482_v33 = vpop.f32.mrb[0].mxu1 }
 0x3f1   : > { %v1483_v50 = vadd.f32 %v1482_v33, %v1386_v7  ;;  %v1655_v51 = vpop.f32.mrb[1].mxu1 }
 0x3f3   : > { %v1486_v52 = vmax.f32 %v1483_v50, 0.0 }
 0x3f5   : > { %1488 = vst.msk [vmem:[%s217_s10] sm:$0xff] %vm1487_vm11, %v1486_v52 }
 0x3f6   : > { %1750 = shalt.err (!%p1747_p3)
}
 0x3f7   : > { %s1751_s12 = scalar_lea.hbm %s2398_s13, 128  ;;  %s1755_s6 = scalar_lea.hbm %s2445_s5, 256 }
 0x3f8   : > { %p1752_p4 = scmp.ne.s32.totalorder %s2398_s13, %s1751_s12  ;;  %p1756_p9 = scmp.lt.u32.totalorder %s2398_s13, %s2445_s5 }
 0x3f9   : > { %p1757_p10 = scmp.lt.u32.totalorder %s1755_s6, %s1751_s12  ;;  %p1759_p12 = scmp.lt.u32.totalorder %s1751_s12, %s2398_s13 }
 0x3fa   : > { %p1753_p7 = pnand %p1752_p4, %p1887_p5 }
 0x3fb   : > { %p1758_p11 = por %p1757_p10, %p1756_p9 }
 0x3fc   : > { %p1754_p8 = pneg %p1753_p7 }
 0x3fd   : > { %p1760_p13 = por %p1759_p12, %p1758_p11 }
 0x3ff   : > { %p1761_p0 = pnand %p1760_p13, %p1754_p8 }
 0x401   : > { %1764 = shalt.err (!%p1761_p0)
}
 0x402   : > { %1680 = dma.vmem_to_hbm [thread:$0]  (%p1887_p5), %s2400_s17, 128, %s2398_s13, %s1490_s15  }
 0x403 PF: > { %p1686_p1 = scmp.ge.s32.totalorder %s1799_s21, 2  ;;  %s1515_s9 = sand.u32 1, %s1787_s18  }
 0x404   : > { %s1516_s10 = scalar_lea.sflag [#allocation7], %s1515_s9 }
 0x405   : > { %p1683_p2 = pnand %p1686_p1, %p1891_p6 }
 0x407   : > { %1782 = dma.done.wait (!%p1683_p2), %s1516_s10, 128  }
 0x408   : > { %1784 = vsyncadd (!%p1683_p2), %s1516_s10, 4294967168  ;;  %p15_p3 = scmp.ge.s32.totalorder %s1874_s24, 4   ;;  %s2450_s18 = smov %s1791_s19 }
 0x409   : > { %s2451_s19 = smov %s1795_s20  ;;  %s2452_s20 = smov %s1885_s27 }
 0x40a   : > { %s2453_s21 = smov %s1874_s24  ;;  %17 = sbr.rel (!%p15_p3) target bundleno = 3 (0x3), region = 81 }
 0x411   :  { %1521 = vsyncpa [#allocation7], 1 }
 0x412   :  { %1523 = vsyncpa [#allocation7 + $0x1], 1 }

</bundles_post_ra>
